<compile_context>
chip_gen: v7x
topology: tpu7x:2x2x1
jax: 0.10.0
libtpu: 0.0.40
codegen_flags: <defaults>
</compile_context>

<pallas_src>
import numpy as np
import jax
import jax.numpy as jnp
from jax import lax
from jax.experimental import pallas as pl
from jax.experimental.pallas import tpu as pltpu

# ------------------------- configuration (small shapes) -------------------------
RNN_TYPE = "GRU"
INPUT_SIZE = 16     # fmess feature dim
NODE_FDIM = 16      # fnode feature dim
HIDDEN = 32         # hidden_size
HPAD = 128          # hidden padded to a full lane tile (extra cols stay exactly zero)
DEPTH = 3           # message passing depth
DROPOUT = 0.0       # eval-mode dropout == identity
N_NODES = 8         # number of nodes  (row 0 is padding node)
N_MESS = 16         # number of directed messages (row 0 is padding message)
MAX_NB = 4          # max neighbors per node / message


# --------------------------------- Pallas kernel ---------------------------------
def mpn_encoder_kernel(fnode_ref, fmess_ref, bgstack_ref, agsum_ref,
                       wxcat_ref, bcat_ref, wzh_ref, ur_ref, whh_ref,
                       won_ref, woh_ref, bo_ref,
                       mmask_ref, nmask_ref,
                       out_node_ref, out_h_ref):
    x = fmess_ref[...]                        # (E, input_size)
    mmask = mmask_ref[...]                    # (E, 1) — zeros out padding message 0
    bg = bgstack_ref[...]                     # (MAX_NB*E, E) stacked one-hot gather
    wzh = wzh_ref[...]                        # (HPAD, HPAD)
    ur = ur_ref[...]                          # (HPAD, HPAD)
    whh = whh_ref[...]                        # (HPAD, HPAD)

    # Loop-invariant x-side projections: single fused MXU matmul + one bias add,
    # hoisted out of the depth loop.  Column slices land on 128-lane boundaries.
    x3 = jnp.dot(x, wxcat_ref[...], preferred_element_type=jnp.float32) + bcat_ref[...]
    xz = x3[:, 0 * HPAD:1 * HPAD]             # W_z x + b_z
    xr = x3[:, 1 * HPAD:2 * HPAD]             # W_r x + b_{ur}
    xh = x3[:, 2 * HPAD:3 * HPAD]             # W_h x + b_h

    h = jnp.zeros((N_MESS, HPAD), jnp.float32)
    for _ in range(DEPTH):                    # static unroll (DEPTH small & fixed)
        # h_nei[k] == h[bgraph[:, k]] — one stacked MXU push, then tile-aligned slices.
        big = jnp.dot(bg, h, preferred_element_type=jnp.float32)        # (MAX_NB*E, HPAD)
        big_ur = jnp.dot(big, ur, preferred_element_type=jnp.float32)   # U_r over all slots
        h_nei = [big[k * N_MESS:(k + 1) * N_MESS, :] for k in range(MAX_NB)]
        sum_h = h_nei[0]
        for k in range(1, MAX_NB):
            sum_h = sum_h + h_nei[k]
        # z = sigmoid(W_z([x, sum_h]))
        z = jax.nn.sigmoid(xz + jnp.dot(sum_h, wzh, preferred_element_type=jnp.float32))
        # r_k = sigmoid(W_r x + U_r h_nei_k);  gated = sum_k r_k * h_nei_k
        gated = jnp.zeros_like(sum_h)
        for k in range(MAX_NB):
            rk = jax.nn.sigmoid(xr + big_ur[k * N_MESS:(k + 1) * N_MESS, :])
            gated = gated + rk * h_nei[k]
        # pre_h = tanh(W_h([x, gated]))
        pre_h = jnp.tanh(xh + jnp.dot(gated, whh, preferred_element_type=jnp.float32))
        h = ((1.0 - z) * sum_h + z * pre_h) * mmask

    out_h_ref[...] = h                        # second output of forward() (padded cols 0)

    # nei_message = index_select_ND(h, 0, agraph).sum(dim=1)  ==  ag_sum @ h (one dot)
    nei = jnp.dot(agsum_ref[...], h, preferred_element_type=jnp.float32)

    # node_hiddens = ReLU(W_o(cat([fnode, nei_message])))
    node_h = (jnp.dot(fnode_ref[...], won_ref[...], preferred_element_type=jnp.float32)
              + jnp.dot(nei, woh_ref[...], preferred_element_type=jnp.float32)
              + bo_ref[...])
    node_h = jnp.maximum(node_h, 0.0)
    # TODO(synk): nn.Dropout is eval-mode identity here; train-mode masking not implemented.
    out_node_ref[...] = node_h * nmask_ref[...]      # zero out padding node 0


# ----------------------------------- wrapper -------------------------------------
def _pad2d(w, rows, cols):
    out = jnp.zeros((rows, cols), jnp.float32)
    return out.at[:w.shape[0], :w.shape[1]].set(w)


def mpn_encoder_forward(fnode, fmess, agraph, bgraph, params):
    E = fmess.shape[0]
    N = fnode.shape[0]

    # Pre-lower gathers (glue, not the hot path):
    #   bgraph -> stacked one-hot (MAX_NB*E, E) : one dot per depth step gives all h_nei.
    #   agraph -> summed count matrix (N, E)    : readout only needs the neighbor sum.
    bg_oh = jax.nn.one_hot(bgraph, E, dtype=jnp.float32)                 # (E, MAX_NB, E)
    bg_stack = jnp.transpose(bg_oh, (1, 0, 2)).reshape(MAX_NB * E, E)    # (MAX_NB*E, E)
    ag_sum = jax.nn.one_hot(agraph, E, dtype=jnp.float32).sum(axis=1)    # (N, E)

    # Zero-pad hidden dim to HPAD lanes; fuse the three x-side weights/biases.
    wx_cat = jnp.concatenate([_pad2d(params["wzx"], INPUT_SIZE, HPAD),
                              _pad2d(params["wrx"], INPUT_SIZE, HPAD),
                              _pad2d(params["whx"], INPUT_SIZE, HPAD)], axis=1)
    b_cat = jnp.concatenate([_pad2d(params["bz"], 1, HPAD),
                             _pad2d(params["bur"], 1, HPAD),
                             _pad2d(params["bh"], 1, HPAD)], axis=1)
    wzh = _pad2d(params["wzh"], HPAD, HPAD)
    ur = _pad2d(params["ur"], HPAD, HPAD)
    whh = _pad2d(params["whh"], HPAD, HPAD)
    won = _pad2d(params["won"], NODE_FDIM, HPAD)
    woh = _pad2d(params["woh"], HPAD, HPAD)
    bo = _pad2d(params["bo"], 1, HPAD)

    mmask = jnp.ones((E, 1), jnp.float32).at[0, 0].set(0.0)
    nmask = jnp.ones((N, 1), jnp.float32).at[0, 0].set(0.0)

    inputs = (fnode, fmess, bg_stack, ag_sum,
              wx_cat, b_cat, wzh, ur, whh,
              won, woh, bo, mmask, nmask)

    out_node_p, out_h_p = pl.pallas_call(
        mpn_encoder_kernel,
        out_shape=(jax.ShapeDtypeStruct((N, HPAD), jnp.float32),
                   jax.ShapeDtypeStruct((E, HPAD), jnp.float32)),
        in_specs=[pl.BlockSpec(memory_space=pltpu.MemorySpace.VMEM)] * len(inputs),
        out_specs=(pl.BlockSpec(memory_space=pltpu.MemorySpace.VMEM),
                   pl.BlockSpec(memory_space=pltpu.MemorySpace.VMEM)),
        compiler_params=pltpu.CompilerParams(vmem_limit_bytes=32 * 1024 * 1024),
    )(*inputs)

    # Strip the lane padding (glue outside the kernel).
    return out_node_p[:, :HIDDEN], out_h_p[:, :HIDDEN]


# ----------------------------- pure-JAX reference ---------------------------------
def mpn_encoder_reference(fnode, fmess, agraph, bgraph, params):
    E = fmess.shape[0]
    N = fnode.shape[0]
    mmask = jnp.ones((E, 1), jnp.float32).at[0, 0].set(0.0)
    nmask = jnp.ones((N, 1), jnp.float32).at[0, 0].set(0.0)
    h = jnp.zeros((E, HIDDEN), jnp.float32)
    for _ in range(DEPTH):
        h_nei = h[bgraph]                                   # (E, MAX_NB, H)
        sum_h = h_nei.sum(axis=1)
        z = jax.nn.sigmoid(fmess @ params["wzx"] + sum_h @ params["wzh"] + params["bz"])
        r1 = (fmess @ params["wrx"])[:, None, :]
        r = jax.nn.sigmoid(r1 + h_nei @ params["ur"] + params["bur"])
        gated = (r * h_nei).sum(axis=1)
        pre_h = jnp.tanh(fmess @ params["whx"] + gated @ params["whh"] + params["bh"])
        h = ((1.0 - z) * sum_h + z * pre_h) * mmask
    nei = h[agraph].sum(axis=1)
    node_h = jnp.maximum(fnode @ params["won"] + nei @ params["woh"] + params["bo"], 0.0)
    return node_h * nmask, h


# ------------------------------------- main ---------------------------------------
if __name__ == "__main__":
    key = jax.random.PRNGKey(0)
    keys = jax.random.split(key, 16)

    # Deterministic synthetic parameters (stored transposed: (in, out), y = x @ W + b).
    s = 0.1
    params = {
        "wzx": s * jax.random.normal(keys[0], (INPUT_SIZE, HIDDEN), jnp.float32),
        "wzh": s * jax.random.normal(keys[1], (HIDDEN, HIDDEN), jnp.float32),
        "bz":  s * jax.random.normal(keys[2], (1, HIDDEN), jnp.float32),
        "wrx": s * jax.random.normal(keys[3], (INPUT_SIZE, HIDDEN), jnp.float32),  # W_r has no bias
        "ur":  s * jax.random.normal(keys[4], (HIDDEN, HIDDEN), jnp.float32),
        "bur": s * jax.random.normal(keys[5], (1, HIDDEN), jnp.float32),
        "whx": s * jax.random.normal(keys[6], (INPUT_SIZE, HIDDEN), jnp.float32),
        "whh": s * jax.random.normal(keys[7], (HIDDEN, HIDDEN), jnp.float32),
        "bh":  s * jax.random.normal(keys[8], (1, HIDDEN), jnp.float32),
        "won": s * jax.random.normal(keys[9], (NODE_FDIM, HIDDEN), jnp.float32),
        "woh": s * jax.random.normal(keys[10], (HIDDEN, HIDDEN), jnp.float32),
        "bo":  s * jax.random.normal(keys[11], (1, HIDDEN), jnp.float32),
    }

    # Deterministic synthetic graph inputs.
    fnode = jax.random.normal(keys[12], (N_NODES, NODE_FDIM), jnp.float32)
    fmess = jax.random.normal(keys[13], (N_MESS, INPUT_SIZE), jnp.float32)
    agraph = jax.random.randint(keys[14], (N_NODES, MAX_NB), 0, N_MESS, dtype=jnp.int32)
    bgraph = jax.random.randint(keys[15], (N_MESS, MAX_NB), 0, N_MESS, dtype=jnp.int32)

    out_node, out_h = jax.jit(mpn_encoder_forward)(fnode, fmess, agraph, bgraph, params)
    jax.block_until_ready((out_node, out_h))

    ref_node, ref_h = mpn_encoder_reference(fnode, fmess, agraph, bgraph, params)
    assert np.allclose(np.asarray(out_node), np.asarray(ref_node), atol=1e-4, rtol=1e-4)
    assert np.allclose(np.asarray(out_h), np.asarray(ref_h), atol=1e-4, rtol=1e-4)

    print("KERNEL_OK")
</pallas_src>

<mosaic_0001>
module attributes {stable_mosaic.version = 11 : i64} {
  func.func @mpn_encoder_kernel(%arg0: memref<8x16xf32, #tpu.memory_space<vmem>>, %arg1: memref<16x16xf32, #tpu.memory_space<vmem>>, %arg2: memref<64x16xf32, #tpu.memory_space<vmem>>, %arg3: memref<8x16xf32, #tpu.memory_space<vmem>>, %arg4: memref<16x384xf32, #tpu.memory_space<vmem>>, %arg5: memref<1x384xf32, #tpu.memory_space<vmem>>, %arg6: memref<128x128xf32, #tpu.memory_space<vmem>>, %arg7: memref<128x128xf32, #tpu.memory_space<vmem>>, %arg8: memref<128x128xf32, #tpu.memory_space<vmem>>, %arg9: memref<16x128xf32, #tpu.memory_space<vmem>>, %arg10: memref<128x128xf32, #tpu.memory_space<vmem>>, %arg11: memref<1x128xf32, #tpu.memory_space<vmem>>, %arg12: memref<16x1xf32, #tpu.memory_space<vmem>>, %arg13: memref<8x1xf32, #tpu.memory_space<vmem>>, %arg14: memref<8x128xf32, #tpu.memory_space<vmem>>, %arg15: memref<16x128xf32, #tpu.memory_space<vmem>>) attributes {dimension_semantics = [], scalar_prefetch = 0 : i64, scratch_operands = 0 : i64, tpu.core_type = #tpu.core_type<tc>} {
    %c0 = arith.constant 0 : index
    %c0_0 = arith.constant 0 : index
    %0 = vector.load %arg1[%c0, %c0_0] : memref<16x16xf32, #tpu.memory_space<vmem>>, vector<16x16xf32>
    %c0_1 = arith.constant 0 : index
    %c0_2 = arith.constant 0 : index
    %1 = vector.load %arg12[%c0_1, %c0_2] : memref<16x1xf32, #tpu.memory_space<vmem>>, vector<16x1xf32>
    %c0_3 = arith.constant 0 : index
    %c0_4 = arith.constant 0 : index
    %2 = vector.load %arg2[%c0_3, %c0_4] : memref<64x16xf32, #tpu.memory_space<vmem>>, vector<64x16xf32>
    %c0_5 = arith.constant 0 : index
    %c0_6 = arith.constant 0 : index
    %3 = vector.load %arg6[%c0_5, %c0_6] : memref<128x128xf32, #tpu.memory_space<vmem>>, vector<128x128xf32>
    %c0_7 = arith.constant 0 : index
    %c0_8 = arith.constant 0 : index
    %4 = vector.load %arg7[%c0_7, %c0_8] : memref<128x128xf32, #tpu.memory_space<vmem>>, vector<128x128xf32>
    %c0_9 = arith.constant 0 : index
    %c0_10 = arith.constant 0 : index
    %5 = vector.load %arg8[%c0_9, %c0_10] : memref<128x128xf32, #tpu.memory_space<vmem>>, vector<128x128xf32>
    %c0_11 = arith.constant 0 : index
    %c0_12 = arith.constant 0 : index
    %6 = vector.load %arg4[%c0_11, %c0_12] : memref<16x384xf32, #tpu.memory_space<vmem>>, vector<16x384xf32>
    %cst = arith.constant dense<0.000000e+00> : vector<16x384xf32>
    %7 = tpu.matmul %0, %6, %cst {dimension_numbers = #tpu.dot_dimension_numbers<[1], [0], [0], [1], [0, 0, 1, 1], [], []>} : vector<16x16xf32>, vector<16x384xf32>, vector<16x384xf32> -> vector<16x384xf32>
    %c0_13 = arith.constant 0 : index
    %c0_14 = arith.constant 0 : index
    %8 = vector.load %arg5[%c0_13, %c0_14] : memref<1x384xf32, #tpu.memory_space<vmem>>, vector<1x384xf32>
    %9 = vector.broadcast %8 : vector<1x384xf32> to vector<16x384xf32>
    %10 = arith.addf %7, %9 : vector<16x384xf32>
    %11 = vector.extract_strided_slice %10 {offsets = [0, 0], sizes = [16, 128], strides = [1, 1]} : vector<16x384xf32> to vector<16x128xf32>
    %12 = vector.extract_strided_slice %10 {offsets = [0, 128], sizes = [16, 128], strides = [1, 1]} : vector<16x384xf32> to vector<16x128xf32>
    %13 = vector.extract_strided_slice %10 {offsets = [0, 256], sizes = [16, 128], strides = [1, 1]} : vector<16x384xf32> to vector<16x128xf32>
    %cst_15 = arith.constant 0.000000e+00 : f32
    %14 = vector.broadcast %cst_15 : f32 to vector<16x128xf32>
    %cst_16 = arith.constant dense<0.000000e+00> : vector<64x128xf32>
    %15 = tpu.matmul %2, %14, %cst_16 {dimension_numbers = #tpu.dot_dimension_numbers<[1], [0], [0], [1], [0, 0, 1, 1], [], []>} : vector<64x16xf32>, vector<16x128xf32>, vector<64x128xf32> -> vector<64x128xf32>
    %cst_17 = arith.constant dense<0.000000e+00> : vector<64x128xf32>
    %16 = tpu.matmul %15, %4, %cst_17 {dimension_numbers = #tpu.dot_dimension_numbers<[1], [0], [0], [1], [0, 0, 1, 1], [], []>} : vector<64x128xf32>, vector<128x128xf32>, vector<64x128xf32> -> vector<64x128xf32>
    %17 = vector.extract_strided_slice %15 {offsets = [0, 0], sizes = [16, 128], strides = [1, 1]} : vector<64x128xf32> to vector<16x128xf32>
    %18 = vector.extract_strided_slice %15 {offsets = [16, 0], sizes = [16, 128], strides = [1, 1]} : vector<64x128xf32> to vector<16x128xf32>
    %19 = vector.extract_strided_slice %15 {offsets = [32, 0], sizes = [16, 128], strides = [1, 1]} : vector<64x128xf32> to vector<16x128xf32>
    %20 = vector.extract_strided_slice %15 {offsets = [48, 0], sizes = [16, 128], strides = [1, 1]} : vector<64x128xf32> to vector<16x128xf32>
    %21 = arith.addf %17, %18 : vector<16x128xf32>
    %22 = arith.addf %21, %19 : vector<16x128xf32>
    %23 = arith.addf %22, %20 : vector<16x128xf32>
    %cst_18 = arith.constant dense<0.000000e+00> : vector<16x128xf32>
    %24 = tpu.matmul %23, %3, %cst_18 {dimension_numbers = #tpu.dot_dimension_numbers<[1], [0], [0], [1], [0, 0, 1, 1], [], []>} : vector<16x128xf32>, vector<128x128xf32>, vector<16x128xf32> -> vector<16x128xf32>
    %25 = arith.addf %11, %24 : vector<16x128xf32>
    %26 = arith.negf %25 : vector<16x128xf32>
    %27 = math.exp %26 : vector<16x128xf32>
    %cst_19 = arith.constant 1.000000e+00 : f32
    %28 = vector.broadcast %cst_19 : f32 to vector<16x128xf32>
    %29 = arith.addf %28, %27 : vector<16x128xf32>
    %30 = arith.divf %28, %29 : vector<16x128xf32>
    %cst_20 = arith.constant 0.000000e+00 : f32
    %31 = vector.broadcast %cst_20 : f32 to vector<16x128xf32>
    %32 = vector.extract_strided_slice %16 {offsets = [0, 0], sizes = [16, 128], strides = [1, 1]} : vector<64x128xf32> to vector<16x128xf32>
    %33 = arith.addf %12, %32 : vector<16x128xf32>
    %34 = arith.negf %33 : vector<16x128xf32>
    %35 = math.exp %34 : vector<16x128xf32>
    %cst_21 = arith.constant 1.000000e+00 : f32
    %36 = vector.broadcast %cst_21 : f32 to vector<16x128xf32>
    %37 = arith.addf %36, %35 : vector<16x128xf32>
    %38 = arith.divf %36, %37 : vector<16x128xf32>
    %39 = arith.mulf %38, %17 : vector<16x128xf32>
    %40 = arith.addf %31, %39 : vector<16x128xf32>
    %41 = vector.extract_strided_slice %16 {offsets = [16, 0], sizes = [16, 128], strides = [1, 1]} : vector<64x128xf32> to vector<16x128xf32>
    %42 = arith.addf %12, %41 : vector<16x128xf32>
    %43 = arith.negf %42 : vector<16x128xf32>
    %44 = math.exp %43 : vector<16x128xf32>
    %cst_22 = arith.constant 1.000000e+00 : f32
    %45 = vector.broadcast %cst_22 : f32 to vector<16x128xf32>
    %46 = arith.addf %45, %44 : vector<16x128xf32>
    %47 = arith.divf %45, %46 : vector<16x128xf32>
    %48 = arith.mulf %47, %18 : vector<16x128xf32>
    %49 = arith.addf %40, %48 : vector<16x128xf32>
    %50 = vector.extract_strided_slice %16 {offsets = [32, 0], sizes = [16, 128], strides = [1, 1]} : vector<64x128xf32> to vector<16x128xf32>
    %51 = arith.addf %12, %50 : vector<16x128xf32>
    %52 = arith.negf %51 : vector<16x128xf32>
    %53 = math.exp %52 : vector<16x128xf32>
    %cst_23 = arith.constant 1.000000e+00 : f32
    %54 = vector.broadcast %cst_23 : f32 to vector<16x128xf32>
    %55 = arith.addf %54, %53 : vector<16x128xf32>
    %56 = arith.divf %54, %55 : vector<16x128xf32>
    %57 = arith.mulf %56, %19 : vector<16x128xf32>
    %58 = arith.addf %49, %57 : vector<16x128xf32>
    %59 = vector.extract_strided_slice %16 {offsets = [48, 0], sizes = [16, 128], strides = [1, 1]} : vector<64x128xf32> to vector<16x128xf32>
    %60 = arith.addf %12, %59 : vector<16x128xf32>
    %61 = arith.negf %60 : vector<16x128xf32>
    %62 = math.exp %61 : vector<16x128xf32>
    %cst_24 = arith.constant 1.000000e+00 : f32
    %63 = vector.broadcast %cst_24 : f32 to vector<16x128xf32>
    %64 = arith.addf %63, %62 : vector<16x128xf32>
    %65 = arith.divf %63, %64 : vector<16x128xf32>
    %66 = arith.mulf %65, %20 : vector<16x128xf32>
    %67 = arith.addf %58, %66 : vector<16x128xf32>
    %cst_25 = arith.constant dense<0.000000e+00> : vector<16x128xf32>
    %68 = tpu.matmul %67, %5, %cst_25 {dimension_numbers = #tpu.dot_dimension_numbers<[1], [0], [0], [1], [0, 0, 1, 1], [], []>} : vector<16x128xf32>, vector<128x128xf32>, vector<16x128xf32> -> vector<16x128xf32>
    %69 = arith.addf %13, %68 : vector<16x128xf32>
    %70 = math.tanh %69 : vector<16x128xf32>
    %cst_26 = arith.constant 1.000000e+00 : f32
    %71 = vector.broadcast %cst_26 : f32 to vector<16x128xf32>
    %72 = arith.subf %71, %30 : vector<16x128xf32>
    %73 = arith.mulf %72, %23 : vector<16x128xf32>
    %74 = arith.mulf %30, %70 : vector<16x128xf32>
    %75 = arith.addf %73, %74 : vector<16x128xf32>
    %76 = vector.broadcast %1 : vector<16x1xf32> to vector<16x128xf32>
    %77 = arith.mulf %75, %76 : vector<16x128xf32>
    %cst_27 = arith.constant dense<0.000000e+00> : vector<64x128xf32>
    %78 = tpu.matmul %2, %77, %cst_27 {dimension_numbers = #tpu.dot_dimension_numbers<[1], [0], [0], [1], [0, 0, 1, 1], [], []>} : vector<64x16xf32>, vector<16x128xf32>, vector<64x128xf32> -> vector<64x128xf32>
    %cst_28 = arith.constant dense<0.000000e+00> : vector<64x128xf32>
    %79 = tpu.matmul %78, %4, %cst_28 {dimension_numbers = #tpu.dot_dimension_numbers<[1], [0], [0], [1], [0, 0, 1, 1], [], []>} : vector<64x128xf32>, vector<128x128xf32>, vector<64x128xf32> -> vector<64x128xf32>
    %80 = vector.extract_strided_slice %78 {offsets = [0, 0], sizes = [16, 128], strides = [1, 1]} : vector<64x128xf32> to vector<16x128xf32>
    %81 = vector.extract_strided_slice %78 {offsets = [16, 0], sizes = [16, 128], strides = [1, 1]} : vector<64x128xf32> to vector<16x128xf32>
    %82 = vector.extract_strided_slice %78 {offsets = [32, 0], sizes = [16, 128], strides = [1, 1]} : vector<64x128xf32> to vector<16x128xf32>
    %83 = vector.extract_strided_slice %78 {offsets = [48, 0], sizes = [16, 128], strides = [1, 1]} : vector<64x128xf32> to vector<16x128xf32>
    %84 = arith.addf %80, %81 : vector<16x128xf32>
    %85 = arith.addf %84, %82 : vector<16x128xf32>
    %86 = arith.addf %85, %83 : vector<16x128xf32>
    %cst_29 = arith.constant dense<0.000000e+00> : vector<16x128xf32>
    %87 = tpu.matmul %86, %3, %cst_29 {dimension_numbers = #tpu.dot_dimension_numbers<[1], [0], [0], [1], [0, 0, 1, 1], [], []>} : vector<16x128xf32>, vector<128x128xf32>, vector<16x128xf32> -> vector<16x128xf32>
    %88 = arith.addf %11, %87 : vector<16x128xf32>
    %89 = arith.negf %88 : vector<16x128xf32>
    %90 = math.exp %89 : vector<16x128xf32>
    %cst_30 = arith.constant 1.000000e+00 : f32
    %91 = vector.broadcast %cst_30 : f32 to vector<16x128xf32>
    %92 = arith.addf %91, %90 : vector<16x128xf32>
    %93 = arith.divf %91, %92 : vector<16x128xf32>
    %cst_31 = arith.constant 0.000000e+00 : f32
    %94 = vector.broadcast %cst_31 : f32 to vector<16x128xf32>
    %95 = vector.extract_strided_slice %79 {offsets = [0, 0], sizes = [16, 128], strides = [1, 1]} : vector<64x128xf32> to vector<16x128xf32>
    %96 = arith.addf %12, %95 : vector<16x128xf32>
    %97 = arith.negf %96 : vector<16x128xf32>
    %98 = math.exp %97 : vector<16x128xf32>
    %cst_32 = arith.constant 1.000000e+00 : f32
    %99 = vector.broadcast %cst_32 : f32 to vector<16x128xf32>
    %100 = arith.addf %99, %98 : vector<16x128xf32>
    %101 = arith.divf %99, %100 : vector<16x128xf32>
    %102 = arith.mulf %101, %80 : vector<16x128xf32>
    %103 = arith.addf %94, %102 : vector<16x128xf32>
    %104 = vector.extract_strided_slice %79 {offsets = [16, 0], sizes = [16, 128], strides = [1, 1]} : vector<64x128xf32> to vector<16x128xf32>
    %105 = arith.addf %12, %104 : vector<16x128xf32>
    %106 = arith.negf %105 : vector<16x128xf32>
    %107 = math.exp %106 : vector<16x128xf32>
    %cst_33 = arith.constant 1.000000e+00 : f32
    %108 = vector.broadcast %cst_33 : f32 to vector<16x128xf32>
    %109 = arith.addf %108, %107 : vector<16x128xf32>
    %110 = arith.divf %108, %109 : vector<16x128xf32>
    %111 = arith.mulf %110, %81 : vector<16x128xf32>
    %112 = arith.addf %103, %111 : vector<16x128xf32>
    %113 = vector.extract_strided_slice %79 {offsets = [32, 0], sizes = [16, 128], strides = [1, 1]} : vector<64x128xf32> to vector<16x128xf32>
    %114 = arith.addf %12, %113 : vector<16x128xf32>
    %115 = arith.negf %114 : vector<16x128xf32>
    %116 = math.exp %115 : vector<16x128xf32>
    %cst_34 = arith.constant 1.000000e+00 : f32
    %117 = vector.broadcast %cst_34 : f32 to vector<16x128xf32>
    %118 = arith.addf %117, %116 : vector<16x128xf32>
    %119 = arith.divf %117, %118 : vector<16x128xf32>
    %120 = arith.mulf %119, %82 : vector<16x128xf32>
    %121 = arith.addf %112, %120 : vector<16x128xf32>
    %122 = vector.extract_strided_slice %79 {offsets = [48, 0], sizes = [16, 128], strides = [1, 1]} : vector<64x128xf32> to vector<16x128xf32>
    %123 = arith.addf %12, %122 : vector<16x128xf32>
    %124 = arith.negf %123 : vector<16x128xf32>
    %125 = math.exp %124 : vector<16x128xf32>
    %cst_35 = arith.constant 1.000000e+00 : f32
    %126 = vector.broadcast %cst_35 : f32 to vector<16x128xf32>
    %127 = arith.addf %126, %125 : vector<16x128xf32>
    %128 = arith.divf %126, %127 : vector<16x128xf32>
    %129 = arith.mulf %128, %83 : vector<16x128xf32>
    %130 = arith.addf %121, %129 : vector<16x128xf32>
    %cst_36 = arith.constant dense<0.000000e+00> : vector<16x128xf32>
    %131 = tpu.matmul %130, %5, %cst_36 {dimension_numbers = #tpu.dot_dimension_numbers<[1], [0], [0], [1], [0, 0, 1, 1], [], []>} : vector<16x128xf32>, vector<128x128xf32>, vector<16x128xf32> -> vector<16x128xf32>
    %132 = arith.addf %13, %131 : vector<16x128xf32>
    %133 = math.tanh %132 : vector<16x128xf32>
    %cst_37 = arith.constant 1.000000e+00 : f32
    %134 = vector.broadcast %cst_37 : f32 to vector<16x128xf32>
    %135 = arith.subf %134, %93 : vector<16x128xf32>
    %136 = arith.mulf %135, %86 : vector<16x128xf32>
    %137 = arith.mulf %93, %133 : vector<16x128xf32>
    %138 = arith.addf %136, %137 : vector<16x128xf32>
    %139 = vector.broadcast %1 : vector<16x1xf32> to vector<16x128xf32>
    %140 = arith.mulf %138, %139 : vector<16x128xf32>
    %cst_38 = arith.constant dense<0.000000e+00> : vector<64x128xf32>
    %141 = tpu.matmul %2, %140, %cst_38 {dimension_numbers = #tpu.dot_dimension_numbers<[1], [0], [0], [1], [0, 0, 1, 1], [], []>} : vector<64x16xf32>, vector<16x128xf32>, vector<64x128xf32> -> vector<64x128xf32>
    %cst_39 = arith.constant dense<0.000000e+00> : vector<64x128xf32>
    %142 = tpu.matmul %141, %4, %cst_39 {dimension_numbers = #tpu.dot_dimension_numbers<[1], [0], [0], [1], [0, 0, 1, 1], [], []>} : vector<64x128xf32>, vector<128x128xf32>, vector<64x128xf32> -> vector<64x128xf32>
    %143 = vector.extract_strided_slice %141 {offsets = [0, 0], sizes = [16, 128], strides = [1, 1]} : vector<64x128xf32> to vector<16x128xf32>
    %144 = vector.extract_strided_slice %141 {offsets = [16, 0], sizes = [16, 128], strides = [1, 1]} : vector<64x128xf32> to vector<16x128xf32>
    %145 = vector.extract_strided_slice %141 {offsets = [32, 0], sizes = [16, 128], strides = [1, 1]} : vector<64x128xf32> to vector<16x128xf32>
    %146 = vector.extract_strided_slice %141 {offsets = [48, 0], sizes = [16, 128], strides = [1, 1]} : vector<64x128xf32> to vector<16x128xf32>
    %147 = arith.addf %143, %144 : vector<16x128xf32>
    %148 = arith.addf %147, %145 : vector<16x128xf32>
    %149 = arith.addf %148, %146 : vector<16x128xf32>
    %cst_40 = arith.constant dense<0.000000e+00> : vector<16x128xf32>
    %150 = tpu.matmul %149, %3, %cst_40 {dimension_numbers = #tpu.dot_dimension_numbers<[1], [0], [0], [1], [0, 0, 1, 1], [], []>} : vector<16x128xf32>, vector<128x128xf32>, vector<16x128xf32> -> vector<16x128xf32>
    %151 = arith.addf %11, %150 : vector<16x128xf32>
    %152 = arith.negf %151 : vector<16x128xf32>
    %153 = math.exp %152 : vector<16x128xf32>
    %cst_41 = arith.constant 1.000000e+00 : f32
    %154 = vector.broadcast %cst_41 : f32 to vector<16x128xf32>
    %155 = arith.addf %154, %153 : vector<16x128xf32>
    %156 = arith.divf %154, %155 : vector<16x128xf32>
    %cst_42 = arith.constant 0.000000e+00 : f32
    %157 = vector.broadcast %cst_42 : f32 to vector<16x128xf32>
    %158 = vector.extract_strided_slice %142 {offsets = [0, 0], sizes = [16, 128], strides = [1, 1]} : vector<64x128xf32> to vector<16x128xf32>
    %159 = arith.addf %12, %158 : vector<16x128xf32>
    %160 = arith.negf %159 : vector<16x128xf32>
    %161 = math.exp %160 : vector<16x128xf32>
    %cst_43 = arith.constant 1.000000e+00 : f32
    %162 = vector.broadcast %cst_43 : f32 to vector<16x128xf32>
    %163 = arith.addf %162, %161 : vector<16x128xf32>
    %164 = arith.divf %162, %163 : vector<16x128xf32>
    %165 = arith.mulf %164, %143 : vector<16x128xf32>
    %166 = arith.addf %157, %165 : vector<16x128xf32>
    %167 = vector.extract_strided_slice %142 {offsets = [16, 0], sizes = [16, 128], strides = [1, 1]} : vector<64x128xf32> to vector<16x128xf32>
    %168 = arith.addf %12, %167 : vector<16x128xf32>
    %169 = arith.negf %168 : vector<16x128xf32>
    %170 = math.exp %169 : vector<16x128xf32>
    %cst_44 = arith.constant 1.000000e+00 : f32
    %171 = vector.broadcast %cst_44 : f32 to vector<16x128xf32>
    %172 = arith.addf %171, %170 : vector<16x128xf32>
    %173 = arith.divf %171, %172 : vector<16x128xf32>
    %174 = arith.mulf %173, %144 : vector<16x128xf32>
    %175 = arith.addf %166, %174 : vector<16x128xf32>
    %176 = vector.extract_strided_slice %142 {offsets = [32, 0], sizes = [16, 128], strides = [1, 1]} : vector<64x128xf32> to vector<16x128xf32>
    %177 = arith.addf %12, %176 : vector<16x128xf32>
    %178 = arith.negf %177 : vector<16x128xf32>
    %179 = math.exp %178 : vector<16x128xf32>
    %cst_45 = arith.constant 1.000000e+00 : f32
    %180 = vector.broadcast %cst_45 : f32 to vector<16x128xf32>
    %181 = arith.addf %180, %179 : vector<16x128xf32>
    %182 = arith.divf %180, %181 : vector<16x128xf32>
    %183 = arith.mulf %182, %145 : vector<16x128xf32>
    %184 = arith.addf %175, %183 : vector<16x128xf32>
    %185 = vector.extract_strided_slice %142 {offsets = [48, 0], sizes = [16, 128], strides = [1, 1]} : vector<64x128xf32> to vector<16x128xf32>
    %186 = arith.addf %12, %185 : vector<16x128xf32>
    %187 = arith.negf %186 : vector<16x128xf32>
    %188 = math.exp %187 : vector<16x128xf32>
    %cst_46 = arith.constant 1.000000e+00 : f32
    %189 = vector.broadcast %cst_46 : f32 to vector<16x128xf32>
    %190 = arith.addf %189, %188 : vector<16x128xf32>
    %191 = arith.divf %189, %190 : vector<16x128xf32>
    %192 = arith.mulf %191, %146 : vector<16x128xf32>
    %193 = arith.addf %184, %192 : vector<16x128xf32>
    %cst_47 = arith.constant dense<0.000000e+00> : vector<16x128xf32>
    %194 = tpu.matmul %193, %5, %cst_47 {dimension_numbers = #tpu.dot_dimension_numbers<[1], [0], [0], [1], [0, 0, 1, 1], [], []>} : vector<16x128xf32>, vector<128x128xf32>, vector<16x128xf32> -> vector<16x128xf32>
    %195 = arith.addf %13, %194 : vector<16x128xf32>
    %196 = math.tanh %195 : vector<16x128xf32>
    %cst_48 = arith.constant 1.000000e+00 : f32
    %197 = vector.broadcast %cst_48 : f32 to vector<16x128xf32>
    %198 = arith.subf %197, %156 : vector<16x128xf32>
    %199 = arith.mulf %198, %149 : vector<16x128xf32>
    %200 = arith.mulf %156, %196 : vector<16x128xf32>
    %201 = arith.addf %199, %200 : vector<16x128xf32>
    %202 = vector.broadcast %1 : vector<16x1xf32> to vector<16x128xf32>
    %203 = arith.mulf %201, %202 : vector<16x128xf32>
    %c0_49 = arith.constant 0 : index
    %c0_50 = arith.constant 0 : index
    %204 = vector.load %arg15[%c0_49, %c0_50] : memref<16x128xf32, #tpu.memory_space<vmem>>, vector<16x128xf32>
    tpu.vector_store %arg15[%c0_49, %c0_50], %203 {strides = array<i32>} : memref<16x128xf32, #tpu.memory_space<vmem>>, vector<16x128xf32>,
    %c0_51 = arith.constant 0 : index
    %c0_52 = arith.constant 0 : index
    %205 = vector.load %arg3[%c0_51, %c0_52] : memref<8x16xf32, #tpu.memory_space<vmem>>, vector<8x16xf32>
    %cst_53 = arith.constant dense<0.000000e+00> : vector<8x128xf32>
    %206 = tpu.matmul %205, %203, %cst_53 {dimension_numbers = #tpu.dot_dimension_numbers<[1], [0], [0], [1], [0, 0, 1, 1], [], []>} : vector<8x16xf32>, vector<16x128xf32>, vector<8x128xf32> -> vector<8x128xf32>
    %c0_54 = arith.constant 0 : index
    %c0_55 = arith.constant 0 : index
    %207 = vector.load %arg0[%c0_54, %c0_55] : memref<8x16xf32, #tpu.memory_space<vmem>>, vector<8x16xf32>
    %c0_56 = arith.constant 0 : index
    %c0_57 = arith.constant 0 : index
    %208 = vector.load %arg9[%c0_56, %c0_57] : memref<16x128xf32, #tpu.memory_space<vmem>>, vector<16x128xf32>
    %cst_58 = arith.constant dense<0.000000e+00> : vector<8x128xf32>
    %209 = tpu.matmul %207, %208, %cst_58 {dimension_numbers = #tpu.dot_dimension_numbers<[1], [0], [0], [1], [0, 0, 1, 1], [], []>} : vector<8x16xf32>, vector<16x128xf32>, vector<8x128xf32> -> vector<8x128xf32>
    %c0_59 = arith.constant 0 : index
    %c0_60 = arith.constant 0 : index
    %210 = vector.load %arg10[%c0_59, %c0_60] : memref<128x128xf32, #tpu.memory_space<vmem>>, vector<128x128xf32>
    %cst_61 = arith.constant dense<0.000000e+00> : vector<8x128xf32>
    %211 = tpu.matmul %206, %210, %cst_61 {dimension_numbers = #tpu.dot_dimension_numbers<[1], [0], [0], [1], [0, 0, 1, 1], [], []>} : vector<8x128xf32>, vector<128x128xf32>, vector<8x128xf32> -> vector<8x128xf32>
    %212 = arith.addf %209, %211 : vector<8x128xf32>
    %c0_62 = arith.constant 0 : index
    %c0_63 = arith.constant 0 : index
    %213 = vector.load %arg11[%c0_62, %c0_63] : memref<1x128xf32, #tpu.memory_space<vmem>>, vector<1x128xf32>
    %214 = vector.broadcast %213 : vector<1x128xf32> to vector<8x128xf32>
    %215 = arith.addf %212, %214 : vector<8x128xf32>
    %cst_64 = arith.constant 0.000000e+00 : f32
    %216 = vector.broadcast %cst_64 : f32 to vector<8x128xf32>
    %217 = arith.maximumf %215, %216 : vector<8x128xf32>
    %c0_65 = arith.constant 0 : index
    %c0_66 = arith.constant 0 : index
    %218 = vector.load %arg13[%c0_65, %c0_66] : memref<8x1xf32, #tpu.memory_space<vmem>>, vector<8x1xf32>
    %219 = vector.broadcast %218 : vector<8x1xf32> to vector<8x128xf32>
    %220 = arith.mulf %217, %219 : vector<8x128xf32>
    %c0_67 = arith.constant 0 : index
    %c0_68 = arith.constant 0 : index
    %221 = vector.load %arg14[%c0_67, %c0_68] : memref<8x128xf32, #tpu.memory_space<vmem>>, vector<8x128xf32>
    tpu.vector_store %arg14[%c0_67, %c0_68], %220 {strides = array<i32>} : memref<8x128xf32, #tpu.memory_space<vmem>>, vector<8x128xf32>,
    return
  }
}

</mosaic_0001>

<bundles_post_ra>
// kernel: mpn_encoder_forward.1
= control target key start
LH: loop header
LB: loop body
LE: loop exit
PB: predicated region body
PF: predicated region fallthrough
CT: control target
= control target key end

     0   :  { %21 = vsyncpa [#allocation3], 0  ;;  %vm134_vm0 = vcmask 130048   ;;  %v4203_v4 = vmov 0.0   ;;  %s4187_s0 = inlined_call_operand.vmem [shape: f32[8,16], index: 0, kind: input, shape index: {}]   ;;  %s4188_s1 = inlined_call_operand.vmem [shape: f32[16,16], index: 1, kind: input, shape index: {}]   ;;  %s4189_s2 = inlined_call_operand.vmem [shape: f32[64,16], index: 2, kind: input, shape index: {}]   ;;  %s4190_s3 = inlined_call_operand.vmem [shape: f32[8,16], index: 3, kind: input, shape index: {}]   ;;  %s4191_s4 = inlined_call_operand.vmem [shape: f32[16,384], index: 4, kind: input, shape index: {}]   ;;  %s4192_s5 = inlined_call_operand.vmem [shape: f32[1,384], index: 5, kind: input, shape index: {}]   ;;  %s4193_s6 = inlined_call_operand.vmem [shape: f32[128,128], index: 6, kind: input, shape index: {}]   ;;  %s4194_s7 = inlined_call_operand.vmem [shape: f32[128,128], index: 7, kind: input, shape index: {}]   ;;  %s4195_s8 = inlined_call_operand.vmem [shape: f32[128,128], index: 8, kind: input, shape index: {}]   ;;  %s4196_s9 = inlined_call_operand.vmem [shape: f32[16,128], index: 9, kind: input, shape index: {}]   ;;  %s4197_s10 = inlined_call_operand.vmem [shape: f32[128,128], index: 10, kind: input, shape index: {}]   ;;  %s4198_s11 = inlined_call_operand.vmem [shape: f32[1,128], index: 11, kind: input, shape index: {}]   ;;  %s4199_s12 = inlined_call_operand.vmem [shape: f32[16,1], index: 12, kind: input, shape index: {}]   ;;  %s4200_s13 = inlined_call_operand.vmem [shape: f32[8,1], index: 13, kind: input, shape index: {}]   ;;  %s4201_s14 = inlined_call_operand.hbm [shape: f32[8,128], index: 14, kind: output, shape index: {0}]   ;;  %s4202_s15 = inlined_call_operand.hbm [shape: f32[16,128], index: 15, kind: output, shape index: {1}]  }
   0x1   :  { %v113_v0 = vld [vmem:[%s4191_s4 + $0x10] sm:$0xff]  ;;  %v116_v1 = vld [vmem:[%s4191_s4 + $0x28] sm:$0xff]  ;;  %v51_v2 = vld [vmem:[%s4188_s1] sm:$0xff]  ;;  %205 = vmatprep.mubr.f32.mxu0 %v4203_v4 }
   0x2   :  { %v2755_v3 = vpack.c.bf16 %v116_v1, %v113_v0  ;;  %2311 = vmatprep.mubr.msk.f32.mxu1 %vm134_vm0, %v51_v2  ;;  %v52_v5 = vld [vmem:[%s4188_s1 + $0x8] sm:$0xff]  ;;  %v3382_v6 = vld [vmem:[%s4189_s2] sm:$0xff]  ;;  %v114_v11 = vld [vmem:[%s4191_s4 + $0x18] sm:$0xff] }
   0x3   :  { %v112_v7 = vld [vmem:[%s4191_s4 + $0x8] sm:$0xff]  ;;  %v115_v8 = vld [vmem:[%s4191_s4 + $0x20] sm:$0xff]  ;;  %v81_v16 = vld [vmem:[%s4194_s7 + $0x10] sm:$0xff] }
   0x4   :  { %2756 = vmatprep.subr.bf16.mxu1 %v2755_v3  ;;  %v111_v9 = vld [vmem:[%s4191_s4] sm:$0xff]  ;;  %v2751_v10 = vpack.c.bf16 %v115_v8, %v112_v7  ;;  %v80_v13 = vld [vmem:[%s4194_s7 + $0x8] sm:$0xff]  ;;  %v82_v17 = vld [vmem:[%s4194_s7 + $0x18] sm:$0xff] }
   0x5   :  { %2758 = vmatpush3.bf16.msra.mxu1 %v2755_v3  ;;  %v79_v12 = vld [vmem:[%s4194_s7] sm:$0xff]  ;;  %v2753_v14 = vpack.c.bf16 %v114_v11, %v111_v9  ;;  %v3418_v18 = vld [vmem:[%s4189_s2 + $0x8] sm:$0xff]  ;;  %v3429_v21 = vld [vmem:[%s4189_s2 + $0x10] sm:$0xff]  ;;  %v3440_v25 = vpack.c.bf16 %v82_v17, %v81_v16 }
   0x6   :  { %2314 = vmatprep.subr.mxu1 %v4203_v4  ;;  %v3403_v15 = vpack.c.bf16 %v80_v13, %v79_v12  ;;  %2752 = vmatprep.subr.bf16.mxu0 %v2751_v10  ;;  %v63_v19 = vld [vmem:[%s4193_s6] sm:$0xff]  ;;  %v64_v20 = vld [vmem:[%s4193_s6 + $0x8] sm:$0xff]  ;;  %v65_v23 = vld [vmem:[%s4193_s6 + $0x10] sm:$0xff] }
   0x7   :  { %2754 = vmatpush1.bf16.msra.mxu0 %v2753_v14  ;;  %v3431_v22 = vpack.c.bf16 %v64_v20, %v63_v19  ;;  %v66_v24 = vld [vmem:[%s4193_s6 + $0x18] sm:$0xff]  ;;  %v83_v26 = vld [vmem:[%s4194_s7 + $0x20] sm:$0xff]  ;;  %v84_v28 = vld [vmem:[%s4194_s7 + $0x28] sm:$0xff] }
   0x8   :  { %2312 = vmatmul.mubr.msk.f32.vlgmr.msra.gmra.mrb[0].mxu1 %vm134_vm0, %v52_v5  ;;  %2760 = vmatprep.subr.bf16.mxu0 %v3403_v15  ;;  %v3445_v27 = vpack.c.bf16 %v66_v24, %v65_v23  ;;  %v67_v29 = vld [vmem:[%s4193_s6 + $0x20] sm:$0xff]  ;;  %v68_v30 = vld [vmem:[%s4193_s6 + $0x28] sm:$0xff]  ;;  %v3464_v31 = vld [vmem:[%s4189_s2 + $0x18] sm:$0xff] }
   0x9   :  { %2315 = vmatpush3.msra.mxu1 %v4203_v4  ;;  %2316 = vmatprep.mubr.msk.f32.mxu1 %vm134_vm0, %v3382_v6 }
   0xa   :  { %2792 = vmatprep.subr.bf16.mxu1 %v3431_v22  ;;  %2010 = vmatmul.mubr.msk.f32.vlgmr.msra.gmra.mrb[0].mxu0 %vm134_vm0, %v51_v2 }
   0xc   :  { %2317 = vmatmul.mubr.msk.f32.vlgmr.msra.gmra.mrb[2].mxu1 %vm134_vm0, %v3418_v18 }
   0xd   :  { %2319 = vmatprep.mubr.msk.f32.mxu1 %vm134_vm0, %v3429_v21 }
   0xe   :  { %22 = vsyncpa [#allocation5], 0  ;;  %v3470_v32 = vld [vmem:[%s4189_s2 + $0x20] sm:$0xff]  ;;  %2762 = vmatpush3.bf16.msra.mxu0 %v3403_v15  ;;  %2794 = vmatpush3.bf16.msra.mxu1 %v3431_v22  ;;  %v3475_v33 = vpack.c.bf16 %v84_v28, %v83_v26  ;;  %v3478_v34 = vpack.c.bf16 %v68_v30, %v67_v29  ;;  %v85_v35 = vld [vmem:[%s4194_s7 + $0x30] sm:$0xff]  ;;  %vm3280_vm1 = vmmov 0  }
   0xf   :  { %2764 = vmatprep.subr.bf16.mxu0 %v3440_v25  ;;  %2796 = vmatprep.subr.bf16.mxu1 %v3445_v27  ;;  %v86_v36 = vld [vmem:[%s4194_s7 + $0x38] sm:$0xff]  ;;  %v3494_v37 = vld [vmem:[%s4189_s2 + $0x28] sm:$0xff]  ;;  %v3500_v38 = vld [vmem:[%s4189_s2 + $0x30] sm:$0xff] }
  0x10   :  { %2320 = vmatmul.mubr.msk.f32.gmra.mrb[4].mxu1 %vm134_vm0, %v3464_v31  ;;  %211 = vmatprep.mubr.f32.mxu0 %v4203_v4  ;;  %v3505_v39 = vpack.c.bf16 %v86_v36, %v85_v35  ;;  %v87_v40 = vld [vmem:[%s4194_s7 + $0x40] sm:$0xff]  ;;  %v88_v41 = vld [vmem:[%s4194_s7 + $0x48] sm:$0xff]  ;;  %v3521_v42 = vld [vmem:[%s4189_s2 + $0x38] sm:$0xff] }
  0x11   :  { %2322 = vmatprep.mubr.msk.f32.mxu1 %vm134_vm0, %v3470_v32  ;;  %2011 = vmatmul.mubr.msk.f32.gmra.mrb[2].mxu0 %vm134_vm0, %v52_v5  ;;  %v3526_v43 = vpack.c.bf16 %v88_v41, %v87_v40  ;;  %v89_v44 = vld [vmem:[%s4194_s7 + $0x50] sm:$0xff]  ;;  %v90_v45 = vld [vmem:[%s4194_s7 + $0x58] sm:$0xff]  ;;  %v91_v47 = vld [vmem:[%s4194_s7 + $0x60] sm:$0xff] }
  0x12   :  { %2766 = vmatpush3.bf16.msra.mxu0 %v3440_v25  ;;  %2798 = vmatpush3.bf16.msra.mxu1 %v3445_v27  ;;  %v3538_v46 = vpack.c.bf16 %v90_v45, %v89_v44  ;;  %v92_v48 = vld [vmem:[%s4194_s7 + $0x68] sm:$0xff]  ;;  %v69_v50 = vld [vmem:[%s4193_s6 + $0x30] sm:$0xff]  ;;  %v70_v51 = vld [vmem:[%s4193_s6 + $0x38] sm:$0xff] }
  0x13   :  { %2768 = vmatprep.subr.bf16.mxu0 %v3475_v33  ;;  %2800 = vmatprep.subr.bf16.mxu1 %v3478_v34  ;;  %v3548_v49 = vpack.c.bf16 %v92_v48, %v91_v47  ;;  %v3559_v52 = vpack.c.bf16 %v70_v51, %v69_v50  ;;  %v93_v53 = vld [vmem:[%s4194_s7 + $0x70] sm:$0xff]  ;;  %v94_v54 = vld [vmem:[%s4194_s7 + $0x78] sm:$0xff]  ;;  %v71_v56 = vld [vmem:[%s4193_s6 + $0x40] sm:$0xff] }
  0x14   :  { %2323 = vmatmul.mubr.msk.f32.gmra.mrb[6].mxu1 %vm134_vm0, %v3494_v37  ;;  %v3568_v55 = vpack.c.bf16 %v94_v54, %v93_v53  ;;  %v72_v57 = vld [vmem:[%s4193_s6 + $0x48] sm:$0xff]  ;;  %v73_v59 = vld [vmem:[%s4193_s6 + $0x50] sm:$0xff]  ;;  %v74_v60 = vld [vmem:[%s4193_s6 + $0x58] sm:$0xff] }
  0x15   :  { %2325 = vmatprep.mubr.msk.f32.mxu1 %vm134_vm0, %v3500_v38  ;;  %v3578_v58 = vpack.c.bf16 %v72_v57, %v71_v56  ;;  %v3589_v61 = vpack.c.bf16 %v74_v60, %v73_v59  ;;  %v75_v62 = vld [vmem:[%s4193_s6 + $0x60] sm:$0xff]  ;;  %v76_v63 = vld [vmem:[%s4193_s6 + $0x68] sm:$0xff]  ;;  %v77_v1 = vld [vmem:[%s4193_s6 + $0x70] sm:$0xff] }
  0x16   :  { %2770 = vmatpush3.bf16.msra.mxu0 %v3475_v33  ;;  %2802 = vmatpush3.bf16.msra.mxu1 %v3478_v34  ;;  %v3599_v0 = vpack.c.bf16 %v76_v63, %v75_v62  ;;  %v78_v2 = vld [vmem:[%s4193_s6 + $0x78] sm:$0xff]  ;;  %v95_v36 = vld [vmem:[%s4195_s8] sm:$0xff]  ;;  %v96_v40 = vld [vmem:[%s4195_s8 + $0x8] sm:$0xff] }
  0x17   :  { %2772 = vmatprep.subr.bf16.mxu0 %v3505_v39  ;;  %2804 = vmatprep.subr.bf16.mxu1 %v3559_v52  ;;  %v3609_v3 = vpack.c.bf16 %v78_v2, %v77_v1  ;;  %v3671_v41 = vpack.c.bf16 %v96_v40, %v95_v36  ;;  %v97_v44 = vld [vmem:[%s4195_s8 + $0x10] sm:$0xff]  ;;  %v98_v45 = vld [vmem:[%s4195_s8 + $0x18] sm:$0xff]  ;;  %v99_v48 = vld [vmem:[%s4195_s8 + $0x20] sm:$0xff] }
  0x18   :  { %2326 = vmatmul.mubr.msk.f32.gmra.mrb[8].mxu1 %vm134_vm0, %v3521_v42  ;;  %v3681_v47 = vpack.c.bf16 %v98_v45, %v97_v44  ;;  %v100_v50 = vld [vmem:[%s4195_s8 + $0x28] sm:$0xff]  ;;  %v101_v53 = vld [vmem:[%s4195_s8 + $0x30] sm:$0xff]  ;;  %v102_v54 = vld [vmem:[%s4195_s8 + $0x38] sm:$0xff]  ;;  %v3278_v44 = vmov 0  }
  0x19   :  { %v3691_v51 = vpack.c.bf16 %v100_v50, %v99_v48  ;;  %v3701_v56 = vpack.c.bf16 %v102_v54, %v101_v53  ;;  %v103_v57 = vld [vmem:[%s4195_s8 + $0x40] sm:$0xff]  ;;  %v104_v59 = vld [vmem:[%s4195_s8 + $0x48] sm:$0xff]  ;;  %v105_v62 = vld [vmem:[%s4195_s8 + $0x50] sm:$0xff]  ;;  %3093 = vset.pattern.permute.xlu0 %v3278_v44  ;;  %3094 = vset.pattern.permute.xlu1 %v3278_v44  ;;  %v119_v48 = vlaneseq }
  0x1a   :  { %2774 = vmatpush3.bf16.msra.mxu0 %v3505_v39  ;;  %2806 = vmatpush3.bf16.msra.mxu1 %v3559_v52  ;;  %v3711_v60 = vpack.c.bf16 %v104_v59, %v103_v57  ;;  %v106_v63 = vld [vmem:[%s4195_s8 + $0x58] sm:$0xff]  ;;  %v107_v2 = vld [vmem:[%s4195_s8 + $0x60] sm:$0xff]  ;;  %v54_v45 = vld [vmem:[%s4199_s12 + $0x8] sm:$0xff] }
  0x1b   :  { %2776 = vmatprep.subr.bf16.mxu0 %v3526_v43  ;;  %2808 = vmatprep.subr.bf16.mxu1 %v3578_v58  ;;  %v3721_v1 = vpack.c.bf16 %v106_v63, %v105_v62  ;;  %v53_v40 = vld [vmem:[%s4199_s12] sm:$0xff]  ;;  %v3752_v50 = vshrl.u32 %v119_v48, 7 }
  0x1c   :  { %783 = vperm.xlu0 %3093, %v53_v40   ;;  %v3758_v54 = vld [vmem:[%s4192_s5] sm:$0x7] }
  0x1d   :  { %4217 = vst [vmem:[#allocation8_spill] sm:$0xff] %v3721_v1  ;;  %v125_v53 = vsub.s32 1, %v3752_v50 }
  0x1e   :  { %2778 = vmatpush3.bf16.msra.mxu0 %v3526_v43  ;;  %2810 = vmatpush3.bf16.msra.mxu1 %v3578_v58 }
  0x1f   :  { %2780 = vmatprep.subr.bf16.mxu0 %v3538_v46  ;;  %2812 = vmatprep.subr.bf16.mxu1 %v3589_v61  ;;  %v126_v57 = vrot.slane %v3758_v54, %v125_v53 }
  0x20   :  { %788 = vperm.xlu0 %3093, %v54_v45  }
  0x22   :  { %2782 = vmatpush3.bf16.msra.mxu0 %v3538_v46  ;;  %2814 = vmatpush3.bf16.msra.mxu1 %v3589_v61 }
  0x23   :  { %2784 = vmatprep.subr.bf16.mxu0 %v3548_v49  ;;  %2816 = vmatprep.subr.bf16.mxu1 %v3599_v0 }
  0x26   :  { %2786 = vmatpush3.bf16.msra.mxu0 %v3548_v49  ;;  %2818 = vmatpush3.bf16.msra.mxu1 %v3599_v0 }
  0x27   :  { %2788 = vmatprep.subr.bf16.mxu0 %v3568_v55  ;;  %2820 = vmatprep.subr.bf16.mxu1 %v3609_v3 }
  0x2a   :  { %2790 = vmatpush3.bf16.msra.mxu0 %v3568_v55  ;;  %2822 = vmatpush3.bf16.msra.mxu1 %v3609_v3 }
  0x2b   :  { %2824 = vmatprep.subr.bf16.mxu0 %v3671_v41 }
  0xdb   :  { %v3613_v5 = vpop.f32.mrb[0].mxu1 }
  0xdc   :  { %v3615_v7 = vpop.f32.mrb[1].mxu1 }
  0xdd   :  { %v3621_v10 = vpop.f32.mrb[0].mxu0 }
  0xde   :  { %v3624_v11 = vpop.f32.mrb[1].mxu0 }
  0xdf   :  { %v3617_v8 = vpop.f32.mrb[2].mxu1  ;;  %v3765_v62 = vadd.f32 %v3624_v11, %v126_v57 }
  0xe0   :  { %v3619_v9 = vpop.f32.mrb[3].mxu1 }
  0xe1   :  { %2360 = vmatprep.mubr.f32.mxu0 %v3619_v9  ;;  %4221 = vst [vmem:[#allocation12_spill] sm:$0xff] %v3765_v62 }
  0xe2   :  { %2361 = vmatmul.mubr.f32.vlgmr.msra.gmra.mrb[4].mxu0 %v3617_v8 }
  0xe3   :  { %v3627_v12 = vpop.f32.mrb[4].mxu1  ;;  %2826 = vmatpush3.bf16.msra.mxu0 %v3671_v41 }
  0xe4   :  { %v528_v13 = vadd.f32 %v3627_v12, %v3617_v8  ;;  %v3631_v14 = vpop.f32.mrb[5].mxu1  ;;  %v3633_v16 = vpop.f32.mrb[2].mxu0  ;;  %2828 = vmatprep.subr.bf16.mxu0 %v3681_v47 }
  0xe5   :  { %v527_v17 = vadd.f32 %v3631_v14, %v3619_v9  ;;  %2363 = vmatprep.mubr.f32.mxu0 %v3631_v14  ;;  %v3638_v19 = vpop.f32.mrb[3].mxu0 }
  0xe6   :  { %2364 = vmatmul.mubr.f32.gmra.mrb[6].mxu0 %v3627_v12  ;;  %v3762_v59 = vadd.f32 %v3638_v19, %v126_v57 }
  0xe7   :  { %v3641_v20 = vpop.f32.mrb[6].mxu1  ;;  %2830 = vmatpush3.bf16.msra.mxu0 %v3681_v47 }
  0xe8   :  { %v530_v23 = vadd.f32 %v3641_v20, %v528_v13  ;;  %v3644_v24 = vpop.f32.mrb[7].mxu1  ;;  %2832 = vmatprep.subr.bf16.mxu0 %v3691_v51  ;;  %v108_v13 = vld [vmem:[%s4195_s8 + $0x68] sm:$0xff]  ;;  %4220 = vst [vmem:[#allocation11_spill] sm:$0xff] %v3762_v59 }
  0xe9   :  { %v529_v26 = vadd.f32 %v527_v17, %v3644_v24  ;;  %2366 = vmatprep.mubr.f32.mxu0 %v3644_v24  ;;  %v3729_v17 = vpack.c.bf16 %v108_v13, %v107_v2 }
  0xea   :  { %2367 = vmatmul.mubr.f32.gmra.mrb[8].mxu0 %v3641_v20 }
  0xeb   :  { %v3649_v28 = vpop.f32.mrb[8].mxu1  ;;  %2834 = vmatpush3.bf16.msra.mxu0 %v3691_v51  ;;  %4218 = vst [vmem:[#allocation9_spill] sm:$0xff] %v3729_v17 }
  0xec   :  { %v3652_v29 = vadd.f32 %v3649_v28, %v530_v23  ;;  %v3654_v30 = vpop.f32.mrb[9].mxu1  ;;  %2836 = vmatprep.subr.bf16.mxu0 %v3701_v56  ;;  %v109_v23 = vld [vmem:[%s4195_s8 + $0x70] sm:$0xff] }
  0xed   :  { %v3657_v35 = vadd.f32 %v529_v26, %v3654_v30  ;;  %2369 = vmatprep.mubr.f32.mxu0 %v3654_v30  ;;  %v110_v26 = vld [vmem:[%s4195_s8 + $0x78] sm:$0xff] }
  0xee   :  { %2370 = vmatmul.mubr.f32.gmra.mrb[10].mxu0 %v3649_v28  ;;  %v3740_v36 = vpack.c.bf16 %v110_v26, %v109_v23 }
  0xef   :  { %2404 = vmatprep.mubr.f32.mxu1 %v3657_v35  ;;  %2838 = vmatpush3.bf16.msra.mxu0 %v3701_v56 }
  0xf0   :  { %2405 = vmatmul.mubr.f32.vlgmr.msra.gmra.mrb[10].mxu1 %v3652_v29  ;;  %2840 = vmatprep.subr.bf16.mxu0 %v3711_v60  ;;  %4219 = vst [vmem:[#allocation10_spill] sm:$0xff] %v3740_v36 }
  0xf1   :  { %2446 = vmatprep.mubr.msk.f32.mxu1 %vm134_vm0, %v3382_v6 }
  0xf3   :  { %2842 = vmatpush3.bf16.msra.mxu0 %v3711_v60 }
  0xf4   :  { %2844 = vmatprep.subr.bf16.mxu0 %v3721_v1 }
  0xf7   :  { %2846 = vmatpush3.bf16.msra.mxu0 %v3721_v1 }
  0xf8   :  { %2848 = vmatprep.subr.bf16.mxu0 %v3729_v17 }
  0xfb   :  { %2850 = vmatpush3.bf16.msra.mxu0 %v3729_v17 }
  0xfc   :  { %2852 = vmatprep.subr.bf16.mxu0 %v3740_v36 }
  0xff   :  { %2854 = vmatpush3.bf16.msra.mxu0 %v3740_v36 }
 0x100   :  { %2892 = vmatprep.subr.bf16.mxu0 %v3431_v22 }
 0x1b5   :  { %v2362_v63 = vpop.f32.mrb[4].mxu0 }
 0x1b6   :  { %v623_v2 = vadd.f32 %v2362_v63, %v3762_v59  ;;  %v488_v13 = vpop.f32.mrb[5].mxu0 }
 0x1b7   :  { %v622_v23 = vadd.f32 %v488_v13, %v3765_v62 }
 0x1b8   :  { %v2025_v26 = vmul.f32 -1.442695, %v623_v2 }
 0x1b9   :  { %v2024_v40 = vmul.f32 -1.442695, %v622_v23  ;;  %v2365_v44 = vpop.f32.mrb[6].mxu0 }
 0x1ba   :  { %3095 = vpow2.f32 %v2025_v26  ;;  %v641_v45 = vadd.f32 %v2365_v44, %v3762_v59  ;;  %v498_v48 = vpop.f32.mrb[7].mxu0 }
 0x1bb   :  { %3097 = vpow2.f32 %v2024_v40  ;;  %v640_v19 = vadd.f32 %v498_v48, %v3765_v62 }
 0x1bc   :  { %v2027_v53 = vmul.f32 -1.442695, %v641_v45 }
 0x1bd   :  { %v2026_v4 = vmul.f32 -1.442695, %v640_v19  ;;  %v2368_v11 = vpop.f32.mrb[8].mxu0 }
 0x1be   :  { %3099 = vpow2.f32 %v2027_v53  ;;  %v659_v57 = vadd.f32 %v2368_v11, %v3762_v59  ;;  %v508_v63 = vpop.f32.mrb[9].mxu0 }
 0x1bf   :  { %3101 = vpow2.f32 %v2026_v4  ;;  %v658_v13 = vadd.f32 %v508_v63, %v3765_v62 }
 0x1c0   :  { %v2029_v2 = vmul.f32 -1.442695, %v659_v57 }
 0x1c1   :  { %v2028_v23 = vmul.f32 -1.442695, %v658_v13  ;;  %v2371_v36 = vpop.f32.mrb[10].mxu0 }
 0x1c2   :  { %3103 = vpow2.f32 %v2029_v2  ;;  %v677_v26 = vadd.f32 %v2371_v36, %v3762_v59  ;;  %v518_v44 = vpop.f32.mrb[11].mxu0 }
 0x1c3   :  { %3105 = vpow2.f32 %v2028_v23  ;;  %v676_v40 = vadd.f32 %v518_v44, %v3765_v62  ;;  %v3775_v45 = vpop.f32.mrb[10].mxu1 }
 0x1c4   :  { %v3096_v48 = vpop.eup %3095  ;;  %v2031_v19 = vmul.f32 -1.442695, %v677_v26  ;;  %v3777_v53 = vpop.f32.mrb[11].mxu1 }
 0x1c5   :  { %v3098_v11 = vpop.eup %3097  ;;  %v631_v4 = vadd.f32 1.0, %v3096_v48  ;;  %v2030_v17 = vmul.f32 -1.442695, %v676_v40 }
 0x1c6   :  { %v630_v63 = vadd.f32 1.0, %v3098_v11  ;;  %3107 = vpow2.f32 %v2031_v19 }
 0x1c7   :  { %3109 = vrcp.f32 %v631_v4 }
 0x1c8   :  { %v3100_v57 = vpop.eup %3099  ;;  %3111 = vrcp.f32 %v630_v63 }
 0x1c9   :  { %v3102_v13 = vpop.eup %3101  ;;  %v649_v36 = vadd.f32 1.0, %v3100_v57  ;;  %3113 = vpow2.f32 %v2030_v17 }
 0x1ca   :  { %v648_v2 = vadd.f32 1.0, %v3102_v13 }
 0x1cb   :  { %3115 = vrcp.f32 %v649_v36 }
 0x1cc   :  { %v3104_v23 = vpop.eup %3103  ;;  %3117 = vrcp.f32 %v648_v2 }
 0x1cd   :  { %v3106_v44 = vpop.eup %3105  ;;  %v667_v62 = vadd.f32 1.0, %v3104_v23 }
 0x1ce   :  { %v666_v26 = vadd.f32 1.0, %v3106_v44 }
 0x1cf   :  { %3119 = vrcp.f32 %v667_v62 }
 0x1d0   :  { %v3108_v59 = vpop.eup %3107  ;;  %3121 = vrcp.f32 %v666_v26 }
 0x1d1   :  { %v3110_v48 = vpop.eup %3109  ;;  %v685_v40 = vadd.f32 1.0, %v3108_v59 }
 0x1d2   :  { %v3112_v11 = vpop.eup %3111  ;;  %v637_v19 = vmul.f32 %v3110_v48, %v3617_v8 }
 0x1d3   :  { %v3114_v4 = vpop.eup %3113  ;;  %3123 = vrcp.f32 %v685_v40  ;;  %v636_v63 = vmul.f32 %v3112_v11, %v3619_v9 }
 0x1d4   :  { %v684_v17 = vadd.f32 1.0, %v3114_v4 }
 0x1d5   :  { %v3116_v57 = vpop.eup %3115 }
 0x1d6   :  { %v3118_v13 = vpop.eup %3117  ;;  %v655_v36 = vmul.f32 %v3116_v57, %v3627_v12  ;;  %3125 = vrcp.f32 %v684_v17 }
 0x1d7   :  { %v654_v2 = vmul.f32 %v3118_v13, %v3631_v14  ;;  %v121_v14 = vsub.s32 0, %v3752_v50 }
 0x1d8   :  { %v657_v62 = vadd.f32 %v655_v36, %v637_v19  ;;  %v129_v36 = vsub.s32 2, %v3752_v50 }
 0x1d9   :  { %v3120_v23 = vpop.eup %3119  ;;  %v656_v44 = vadd.f32 %v654_v2, %v636_v63 }
 0x1da   :  { %v3122_v26 = vpop.eup %3121  ;;  %v673_v59 = vmul.f32 %v3120_v23, %v3641_v20  ;;  %v122_v20 = vrot.slane %v3758_v54, %v121_v14 }
 0x1db   :  { %v672_v8 = vmul.f32 %v3122_v26, %v3644_v24 }
 0x1dc   :  { %v675_v48 = vadd.f32 %v673_v59, %v657_v62  ;;  %v3805_v24 = vadd.f32 %v3633_v16, %v122_v20  ;;  %v130_v62 = vrot.slane %v3758_v54, %v129_v36  ;;  %v3824_v54 = vpop.permute.xlu0 %783 }
 0x1dd   :  { %v3124_v40 = vpop.eup %3123  ;;  %v674_v1 = vadd.f32 %v672_v8, %v656_v44 }
 0x1de   :  { %v691_v9 = vmul.f32 %v3124_v40, %v3649_v28  ;;  %v3808_v28 = vadd.f32 %v3621_v10, %v122_v20  ;;  %v3817_v10 = vadd.f32 %v3613_v5, %v130_v62 }
 0x1e0   :  { %v3126_v11 = vpop.eup %3125  ;;  %v693_v4 = vadd.f32 %v691_v9, %v675_v48  ;;  %v3828_v14 = vpop.permute.xlu0 %788 }
 0x1e1   :  { %v690_v12 = vmul.f32 %v3126_v11, %v3654_v30  ;;  %v609_v30 = vadd.f32 %v3775_v45, %v3805_v24  ;;  %v3820_v45 = vadd.f32 %v3615_v7, %v130_v62 }
 0x1e3   :  { %v692_v17 = vadd.f32 %v690_v12, %v674_v1  ;;  %v608_v1 = vadd.f32 %v3777_v53, %v3808_v28  ;;  %v2023_v19 = vmul.f32 -1.442695, %v609_v30 }
 0x1e5   :  { %2439 = vmatprep.mubr.f32.mxu0 %v692_v17  ;;  %v2022_v63 = vmul.f32 -1.442695, %v608_v1  ;;  %3127 = vpow2.f32 %v2023_v19 }
 0x1e6   :  { %2440 = vmatmul.mubr.f32.vlgmr.msra.gmra.mrb[12].mxu0 %v693_v4 }
 0x1e7   :  { %2894 = vmatpush3.bf16.msra.mxu0 %v3431_v22  ;;  %3129 = vpow2.f32 %v2022_v63 }
 0x1e8   :  { %2896 = vmatprep.subr.bf16.mxu0 %v3445_v27 }
 0x1eb   :  { %2898 = vmatpush3.bf16.msra.mxu0 %v3445_v27 }
 0x1ec   :  { %2900 = vmatprep.subr.bf16.mxu0 %v3478_v34 }
 0x1ef   :  { %2902 = vmatpush3.bf16.msra.mxu0 %v3478_v34  ;;  %v3128_v57 = vpop.eup %3127 }
 0x1f0   :  { %2904 = vmatprep.subr.bf16.mxu0 %v3559_v52  ;;  %v617_v2 = vadd.f32 1.0, %v3128_v57 }
 0x1f1   :  { %v3130_v13 = vpop.eup %3129 }
 0x1f2   :  { %v616_v16 = vadd.f32 1.0, %v3130_v13  ;;  %3131 = vrcp.f32 %v617_v2 }
 0x1f3   :  { %2906 = vmatpush3.bf16.msra.mxu0 %v3559_v52 }
 0x1f4   :  { %2908 = vmatprep.subr.bf16.mxu0 %v3578_v58  ;;  %3133 = vrcp.f32 %v616_v16 }
 0x1f7   :  { %2910 = vmatpush3.bf16.msra.mxu0 %v3578_v58 }
 0x1f8   :  { %2912 = vmatprep.subr.bf16.mxu0 %v3589_v61 }
 0x1fb   :  { %2914 = vmatpush3.bf16.msra.mxu0 %v3589_v61 }
 0x1fc   :  { %2916 = vmatprep.subr.bf16.mxu0 %v3599_v0  ;;  %v3132_v50 = vpop.eup %3131 }
 0x1fd   :  { %v774_v8 = vsub.f32 1.0, %v3132_v50 }
 0x1fe   :  { %v3134_v59 = vpop.eup %3133 }
 0x1ff   :  { %2918 = vmatpush3.bf16.msra.mxu0 %v3599_v0  ;;  %v773_v48 = vsub.f32 1.0, %v3134_v59  ;;  %v776_v9 = vmul.f32 %v774_v8, %v3652_v29  ;;  %v4225_v8 = vld [vmem:[#allocation11_spill] sm:$0xff] }
 0x200   :  { %2920 = vmatprep.subr.bf16.mxu0 %v3609_v3 }
 0x201   :  { %v775_v11 = vmul.f32 %v773_v48, %v3657_v35 }
 0x203   :  { %2922 = vmatpush3.bf16.msra.mxu0 %v3609_v3 }
 0x2b9   :  { %v2441_v53 = vpop.f32.mrb[12].mxu0 }
 0x2ba   :  { %v770_v23 = vadd.f32 %v2441_v53, %v3817_v10  ;;  %v760_v44 = vpop.f32.mrb[13].mxu0 }
 0x2bb   :  { %v769_v26 = vadd.f32 %v760_v44, %v3820_v45  ;;  %v4222_v44 = vld [vmem:[#allocation8_spill] sm:$0xff] }
 0x2bc   :  { %3135 = vtanh.f32 %v770_v23 }
 0x2bd   :  { %3137 = vtanh.f32 %v769_v26  ;;  %v4223_v26 = vld [vmem:[#allocation9_spill] sm:$0xff] }
 0x2c6   :  { %v3136_v40 = vpop.eup %3135 }
 0x2c7   :  { %v3138_v5 = vpop.eup %3137  ;;  %v778_v7 = vmul.f32 %v3136_v40, %v3132_v50  ;;  %v4224_v50 = vld [vmem:[#allocation10_spill] sm:$0xff]  ;;  %v4226_v40 = vld [vmem:[#allocation12_spill] sm:$0xff] }
 0x2c8   :  { %v777_v4 = vmul.f32 %v3138_v5, %v3134_v59 }
 0x2c9   :  { %v780_v12 = vadd.f32 %v778_v7, %v776_v9 }
 0x2ca   :  { %v779_v17 = vadd.f32 %v777_v4, %v775_v11 }
 0x2cb   :  { %v792_v20 = vmul.f32 %v3828_v14, %v780_v12 }
 0x2cc   :  { %v791_v30 = vmul.f32 %v3824_v54, %v779_v17 }
 0x2ce   :  { %v2855_v1 = vpack.c.bf16 %v792_v20, %v791_v30 }
 0x2d0   :  { %2856 = vmatprep.subr.bf16.mxu1 %v2855_v1 }
 0x2d1   :  { %2858 = vmatpush3.bf16.msra.mxu1 %v2855_v1 }
 0x2d2   :  { %2860 = vmatprep.subr.bf16.mxu1 %v3403_v15 }
 0x2d4   :  { %2447 = vmatmul.mubr.msk.f32.vlgmr.msra.gmra.mrb[12].mxu1 %vm134_vm0, %v3418_v18 }
 0x2d5   :  { %2449 = vmatprep.mubr.msk.f32.mxu1 %vm134_vm0, %v3429_v21  ;;  %2862 = vmatpush3.bf16.msra.mxu1 %v3403_v15 }
 0x2d6   :  { %2864 = vmatprep.subr.bf16.mxu1 %v3440_v25 }
 0x2d8   :  { %2450 = vmatmul.mubr.msk.f32.gmra.mrb[14].mxu1 %vm134_vm0, %v3464_v31 }
 0x2d9   :  { %2452 = vmatprep.mubr.msk.f32.mxu1 %vm134_vm0, %v3470_v32  ;;  %2866 = vmatpush3.bf16.msra.mxu1 %v3440_v25 }
 0x2da   :  { %2868 = vmatprep.subr.bf16.mxu1 %v3475_v33 }
 0x2dc   :  { %2453 = vmatmul.mubr.msk.f32.gmra.mrb[16].mxu1 %vm134_vm0, %v3494_v37 }
 0x2dd   :  { %2455 = vmatprep.mubr.msk.f32.mxu1 %vm134_vm0, %v3500_v38  ;;  %2870 = vmatpush3.bf16.msra.mxu1 %v3475_v33 }
 0x2de   :  { %2872 = vmatprep.subr.bf16.mxu1 %v3505_v39 }
 0x2e0   :  { %2456 = vmatmul.mubr.msk.f32.gmra.mrb[18].mxu1 %vm134_vm0, %v3521_v42 }
 0x2e1   :  { %2874 = vmatpush3.bf16.msra.mxu1 %v3505_v39 }
 0x2e2   :  { %2876 = vmatprep.subr.bf16.mxu1 %v3526_v43 }
 0x2e5   :  { %2878 = vmatpush3.bf16.msra.mxu1 %v3526_v43 }
 0x2e6   :  { %2880 = vmatprep.subr.bf16.mxu1 %v3538_v46 }
 0x2e9   :  { %2882 = vmatpush3.bf16.msra.mxu1 %v3538_v46 }
 0x2ea   :  { %2884 = vmatprep.subr.bf16.mxu1 %v3548_v49 }
 0x2ed   :  { %2886 = vmatpush3.bf16.msra.mxu1 %v3548_v49 }
 0x2ee   :  { %2888 = vmatprep.subr.bf16.mxu1 %v3568_v55 }
 0x2f1   :  { %2890 = vmatpush3.bf16.msra.mxu1 %v3568_v55 }
 0x2f2   :  { %2924 = vmatprep.subr.bf16.mxu1 %v3671_v41 }
 0x3a7   :  { %v3863_v18 = vpop.f32.mrb[12].mxu1 }
 0x3a8   :  { %v3865_v21 = vpop.f32.mrb[13].mxu1 }
 0x3a9   :  { %2490 = vmatprep.mubr.f32.mxu1 %v3865_v21 }
 0x3aa   :  { %2491 = vmatmul.mubr.f32.vlgmr.msra.gmra.mrb[20].mxu1 %v3863_v18 }
 0x3ab   :  { %v3869_v29 = vpop.f32.mrb[14].mxu1  ;;  %2926 = vmatpush3.bf16.msra.mxu1 %v3671_v41 }
 0x3ac   :  { %v1004_v35 = vadd.f32 %v3869_v29, %v3863_v18  ;;  %v3874_v19 = vpop.f32.mrb[15].mxu1  ;;  %2928 = vmatprep.subr.bf16.mxu1 %v3681_v47 }
 0x3ad   :  { %v1003_v63 = vadd.f32 %v3874_v19, %v3865_v21  ;;  %2493 = vmatprep.mubr.f32.mxu1 %v3874_v19 }
 0x3ae   :  { %2494 = vmatmul.mubr.f32.gmra.mrb[22].mxu1 %v3869_v29 }
 0x3af   :  { %v3881_v57 = vpop.f32.mrb[16].mxu1  ;;  %2930 = vmatpush3.bf16.msra.mxu1 %v3681_v47 }
 0x3b0   :  { %v1006_v13 = vadd.f32 %v3881_v57, %v1004_v35  ;;  %v3885_v36 = vpop.f32.mrb[17].mxu1  ;;  %2932 = vmatprep.subr.bf16.mxu1 %v3691_v51 }
 0x3b1   :  { %v1005_v2 = vadd.f32 %v1003_v63, %v3885_v36  ;;  %2496 = vmatprep.mubr.f32.mxu1 %v3885_v36 }
 0x3b2   :  { %2497 = vmatmul.mubr.f32.gmra.mrb[24].mxu1 %v3881_v57 }
 0x3b3   :  { %v3891_v16 = vpop.f32.mrb[18].mxu1  ;;  %2934 = vmatpush3.bf16.msra.mxu1 %v3691_v51 }
 0x3b4   :  { %v3895_v62 = vadd.f32 %v3891_v16, %v1006_v13  ;;  %v3897_v53 = vpop.f32.mrb[19].mxu1  ;;  %2936 = vmatprep.subr.bf16.mxu1 %v3701_v56 }
 0x3b5   :  { %v3901_v23 = vadd.f32 %v1005_v2, %v3897_v53  ;;  %2499 = vmatprep.mubr.f32.mxu1 %v3897_v53 }
 0x3b6   :  { %2500 = vmatmul.mubr.f32.gmra.mrb[26].mxu1 %v3891_v16 }
 0x3b7   :  { %2534 = vmatprep.mubr.f32.mxu0 %v3901_v23  ;;  %2938 = vmatpush3.bf16.msra.mxu1 %v3701_v56 }
 0x3b8   :  { %2535 = vmatmul.mubr.f32.vlgmr.msra.gmra.mrb[14].mxu0 %v3895_v62  ;;  %2940 = vmatprep.subr.bf16.mxu1 %v3711_v60 }
 0x3b9   :  { %2576 = vmatprep.mubr.msk.f32.mxu0 %vm134_vm0, %v3382_v6 }
 0x3bb   :  { %2942 = vmatpush3.bf16.msra.mxu1 %v3711_v60 }
 0x3bc   :  { %2944 = vmatprep.subr.bf16.mxu1 %v4222_v44 }
 0x3bf   :  { %2946 = vmatpush3.bf16.msra.mxu1 %v4222_v44 }
 0x3c0   :  { %2948 = vmatprep.subr.bf16.mxu1 %v4223_v26 }
 0x3c3   :  { %2950 = vmatpush3.bf16.msra.mxu1 %v4223_v26 }
 0x3c4   :  { %2952 = vmatprep.subr.bf16.mxu1 %v4224_v50 }
 0x3c7   :  { %2954 = vmatpush3.bf16.msra.mxu1 %v4224_v50 }
 0x3c8   :  { %2992 = vmatprep.subr.bf16.mxu1 %v3431_v22 }
 0x47d   :  { %v2492_v59 = vpop.f32.mrb[20].mxu1 }
 0x47e   :  { %v1099_v48 = vadd.f32 %v2492_v59, %v4225_v8  ;;  %v964_v6 = vpop.f32.mrb[21].mxu1 }
 0x47f   :  { %v1098_v5 = vadd.f32 %v964_v6, %v4226_v40 }
 0x480   :  { %v2043_v9 = vmul.f32 -1.442695, %v1099_v48 }
 0x481   :  { %v2042_v7 = vmul.f32 -1.442695, %v1098_v5  ;;  %v2495_v11 = vpop.f32.mrb[22].mxu1 }
 0x482   :  { %3139 = vpow2.f32 %v2043_v9  ;;  %v1117_v4 = vadd.f32 %v2495_v11, %v4225_v8  ;;  %v974_v12 = vpop.f32.mrb[23].mxu1 }
 0x483   :  { %3141 = vpow2.f32 %v2042_v7  ;;  %v1116_v17 = vadd.f32 %v974_v12, %v4226_v40 }
 0x484   :  { %v2045_v20 = vmul.f32 -1.442695, %v1117_v4 }
 0x485   :  { %v2044_v30 = vmul.f32 -1.442695, %v1116_v17  ;;  %v2498_v1 = vpop.f32.mrb[24].mxu1 }
 0x486   :  { %3143 = vpow2.f32 %v2045_v20  ;;  %v1135_v35 = vadd.f32 %v2498_v1, %v4225_v8  ;;  %v984_v63 = vpop.f32.mrb[25].mxu1 }
 0x487   :  { %3145 = vpow2.f32 %v2044_v30  ;;  %v1134_v13 = vadd.f32 %v984_v63, %v4226_v40 }
 0x488   :  { %v2047_v2 = vmul.f32 -1.442695, %v1135_v35 }
 0x489   :  { %v2046_v59 = vmul.f32 -1.442695, %v1134_v13  ;;  %v2501_v48 = vpop.f32.mrb[26].mxu1 }
 0x48a   :  { %3147 = vpow2.f32 %v2047_v2  ;;  %v1153_v6 = vadd.f32 %v2501_v48, %v4225_v8  ;;  %v994_v5 = vpop.f32.mrb[27].mxu1 }
 0x48b   :  { %3149 = vpow2.f32 %v2046_v59  ;;  %v1152_v9 = vadd.f32 %v994_v5, %v4226_v40  ;;  %v3927_v7 = vpop.f32.mrb[14].mxu0 }
 0x48c   :  { %v3140_v11 = vpop.eup %3139  ;;  %v2049_v4 = vmul.f32 -1.442695, %v1153_v6  ;;  %v3929_v12 = vpop.f32.mrb[15].mxu0 }
 0x48d   :  { %v3142_v17 = vpop.eup %3141  ;;  %v1107_v20 = vadd.f32 1.0, %v3140_v11  ;;  %v2048_v30 = vmul.f32 -1.442695, %v1152_v9 }
 0x48e   :  { %v1106_v1 = vadd.f32 1.0, %v3142_v17  ;;  %3151 = vpow2.f32 %v2049_v4 }
 0x48f   :  { %3153 = vrcp.f32 %v1107_v20 }
 0x490   :  { %v3144_v35 = vpop.eup %3143  ;;  %3155 = vrcp.f32 %v1106_v1 }
 0x491   :  { %v3146_v63 = vpop.eup %3145  ;;  %v1125_v13 = vadd.f32 1.0, %v3144_v35  ;;  %3157 = vpow2.f32 %v2048_v30 }
 0x492   :  { %v1124_v2 = vadd.f32 1.0, %v3146_v63 }
 0x493   :  { %3159 = vrcp.f32 %v1125_v13 }
 0x494   :  { %v3148_v59 = vpop.eup %3147  ;;  %3161 = vrcp.f32 %v1124_v2 }
 0x495   :  { %v3150_v48 = vpop.eup %3149  ;;  %v1143_v5 = vadd.f32 1.0, %v3148_v59 }
 0x496   :  { %v1142_v6 = vadd.f32 1.0, %v3150_v48 }
 0x497   :  { %3163 = vrcp.f32 %v1143_v5 }
 0x498   :  { %v3152_v40 = vpop.eup %3151  ;;  %3165 = vrcp.f32 %v1142_v6 }
 0x499   :  { %v3154_v11 = vpop.eup %3153  ;;  %v1161_v9 = vadd.f32 1.0, %v3152_v40 }
 0x49a   :  { %v3156_v17 = vpop.eup %3155  ;;  %v1113_v4 = vmul.f32 %v3154_v11, %v3863_v18 }
 0x49b   :  { %v3158_v20 = vpop.eup %3157  ;;  %3167 = vrcp.f32 %v1161_v9  ;;  %v1112_v1 = vmul.f32 %v3156_v17, %v3865_v21 }
 0x49c   :  { %v1160_v30 = vadd.f32 1.0, %v3158_v20 }
 0x49d   :  { %v3160_v35 = vpop.eup %3159 }
 0x49e   :  { %v3162_v63 = vpop.eup %3161  ;;  %v1131_v13 = vmul.f32 %v3160_v35, %v3869_v29  ;;  %3169 = vrcp.f32 %v1160_v30 }
 0x49f   :  { %v1130_v2 = vmul.f32 %v3162_v63, %v3874_v19 }
 0x4a0   :  { %v1133_v59 = vadd.f32 %v1131_v13, %v1113_v4 }
 0x4a1   :  { %v3164_v48 = vpop.eup %3163  ;;  %v1132_v5 = vadd.f32 %v1130_v2, %v1112_v1 }
 0x4a2   :  { %v3166_v6 = vpop.eup %3165  ;;  %v1149_v40 = vmul.f32 %v3164_v48, %v3881_v57 }
 0x4a3   :  { %v1148_v18 = vmul.f32 %v3166_v6, %v3885_v36 }
 0x4a4   :  { %v1151_v11 = vadd.f32 %v1149_v40, %v1133_v59 }
 0x4a5   :  { %v3168_v9 = vpop.eup %3167  ;;  %v1150_v8 = vadd.f32 %v1148_v18, %v1132_v5  ;;  %v3227_v18 = vld [vmem:[%s4189_s2 + $0x8] sm:$0xff] }
 0x4a6   :  { %v1167_v21 = vmul.f32 %v3168_v9, %v3891_v16 }
 0x4a8   :  { %v3170_v17 = vpop.eup %3169  ;;  %v1169_v20 = vadd.f32 %v1167_v21, %v1151_v11  ;;  %v4228_v11 = vld [vmem:[#allocation12_spill] sm:$0xff] }
 0x4a9   :  { %v1166_v29 = vmul.f32 %v3170_v17, %v3897_v53 }
 0x4ab   :  { %v1168_v30 = vadd.f32 %v1166_v29, %v1150_v8 }
 0x4ad   :  { %2569 = vmatprep.mubr.f32.mxu1 %v1168_v30 }
 0x4ae   :  { %2570 = vmatmul.mubr.f32.vlgmr.msra.gmra.mrb[28].mxu1 %v1169_v20 }
 0x4af   :  { %2994 = vmatpush3.bf16.msra.mxu1 %v3431_v22  ;;  %v1085_v22 = vadd.f32 %v3927_v7, %v3805_v24 }
 0x4b0   :  { %2996 = vmatprep.subr.bf16.mxu1 %v3445_v27 }
 0x4b3   :  { %2998 = vmatpush3.bf16.msra.mxu1 %v3445_v27  ;;  %v1084_v27 = vadd.f32 %v3929_v12, %v3808_v28 }
 0x4b4   :  { %3000 = vmatprep.subr.bf16.mxu1 %v3478_v34 }
 0x4b7   :  { %3002 = vmatpush3.bf16.msra.mxu1 %v3478_v34  ;;  %v2041_v34 = vmul.f32 -1.442695, %v1085_v22 }
 0x4b8   :  { %3004 = vmatprep.subr.bf16.mxu1 %v3559_v52 }
 0x4b9   :  { %3171 = vpow2.f32 %v2041_v34 }
 0x4bb   :  { %3006 = vmatpush3.bf16.msra.mxu1 %v3559_v52  ;;  %v2040_v52 = vmul.f32 -1.442695, %v1084_v27 }
 0x4bc   :  { %3008 = vmatprep.subr.bf16.mxu1 %v3578_v58 }
 0x4bd   :  { %3173 = vpow2.f32 %v2040_v52 }
 0x4bf   :  { %3010 = vmatpush3.bf16.msra.mxu1 %v3578_v58 }
 0x4c0   :  { %3012 = vmatprep.subr.bf16.mxu1 %v3589_v61 }
 0x4c3   :  { %3014 = vmatpush3.bf16.msra.mxu1 %v3589_v61  ;;  %v3172_v58 = vpop.eup %3171 }
 0x4c4   :  { %3016 = vmatprep.subr.bf16.mxu1 %v3599_v0  ;;  %v1093_v19 = vadd.f32 1.0, %v3172_v58 }
 0x4c6   :  { %3175 = vrcp.f32 %v1093_v19 }
 0x4c7   :  { %3018 = vmatpush3.bf16.msra.mxu1 %v3599_v0  ;;  %v3174_v61 = vpop.eup %3173 }
 0x4c8   :  { %3020 = vmatprep.subr.bf16.mxu1 %v3609_v3  ;;  %v1092_v57 = vadd.f32 1.0, %v3174_v61 }
 0x4ca   :  { %3177 = vrcp.f32 %v1092_v57 }
 0x4cb   :  { %3022 = vmatpush3.bf16.msra.mxu1 %v3609_v3 }
 0x4d0   :  { %v3176_v53 = vpop.eup %3175 }
 0x4d1   :  { %v1250_v7 = vsub.f32 1.0, %v3176_v53 }
 0x4d3   :  { %v1252_v35 = vmul.f32 %v1250_v7, %v3895_v62  ;;  %v3228_v62 = vld [vmem:[%s4189_s2 + $0x10] sm:$0xff] }
 0x4d4   :  { %v3178_v8 = vpop.eup %3177 }
 0x4d5   :  { %v1249_v12 = vsub.f32 1.0, %v3178_v8 }
 0x4d7   :  { %v1251_v13 = vmul.f32 %v1249_v12, %v3901_v23 }
 0x581   :  { %v2571_v0 = vpop.f32.mrb[28].mxu1 }
 0x582   :  { %v1246_v36 = vadd.f32 %v2571_v0, %v3817_v10  ;;  %v1236_v3 = vpop.f32.mrb[29].mxu1 }
 0x583   :  { %v1245_v16 = vadd.f32 %v1236_v3, %v3820_v45 }
 0x584   :  { %3179 = vtanh.f32 %v1246_v36 }
 0x585   :  { %3181 = vtanh.f32 %v1245_v16 }
 0x58e   :  { %v3180_v4 = vpop.eup %3179 }
 0x58f   :  { %v3182_v1 = vpop.eup %3181  ;;  %v1254_v63 = vmul.f32 %v3180_v4, %v3176_v53 }
 0x590   :  { %v1253_v2 = vmul.f32 %v3182_v1, %v3178_v8 }
 0x591   :  { %v1256_v59 = vadd.f32 %v1254_v63, %v1252_v35 }
 0x592   :  { %v1255_v48 = vadd.f32 %v1253_v2, %v1251_v13 }
 0x593   :  { %v1258_v5 = vmul.f32 %v1256_v59, %v3828_v14 }
 0x594   :  { %v1257_v6 = vmul.f32 %v1255_v48, %v3824_v54 }
 0x596   :  { %v2955_v40 = vpack.c.bf16 %v1258_v5, %v1257_v6 }
 0x598   :  { %2956 = vmatprep.subr.bf16.mxu0 %v2955_v40 }
 0x599   :  { %2958 = vmatpush3.bf16.msra.mxu0 %v2955_v40 }
 0x59a   :  { %2960 = vmatprep.subr.bf16.mxu0 %v3403_v15 }
 0x59c   :  { %2577 = vmatmul.mubr.msk.f32.vlgmr.msra.gmra.mrb[16].mxu0 %vm134_vm0, %v3227_v18 }
 0x59d   :  { %2579 = vmatprep.mubr.msk.f32.mxu0 %vm134_vm0, %v3228_v62  ;;  %2962 = vmatpush3.bf16.msra.mxu0 %v3403_v15 }
 0x59e   :  { %2964 = vmatprep.subr.bf16.mxu0 %v3440_v25 }
 0x5a0   :  { %2580 = vmatmul.mubr.msk.f32.gmra.mrb[18].mxu0 %vm134_vm0, %v3464_v31 }
 0x5a1   :  { %2582 = vmatprep.mubr.msk.f32.mxu0 %vm134_vm0, %v3470_v32  ;;  %2966 = vmatpush3.bf16.msra.mxu0 %v3440_v25 }
 0x5a2   :  { %2968 = vmatprep.subr.bf16.mxu0 %v3475_v33 }
 0x5a4   :  { %2583 = vmatmul.mubr.msk.f32.gmra.mrb[20].mxu0 %vm134_vm0, %v3494_v37 }
 0x5a5   :  { %2585 = vmatprep.mubr.msk.f32.mxu0 %vm134_vm0, %v3500_v38  ;;  %2970 = vmatpush3.bf16.msra.mxu0 %v3475_v33 }
 0x5a6   :  { %2972 = vmatprep.subr.bf16.mxu0 %v3505_v39 }
 0x5a8   :  { %2586 = vmatmul.mubr.msk.f32.gmra.mrb[22].mxu0 %vm134_vm0, %v3521_v42 }
 0x5a9   :  { %2974 = vmatpush3.bf16.msra.mxu0 %v3505_v39 }
 0x5aa   :  { %2976 = vmatprep.subr.bf16.mxu0 %v3526_v43 }
 0x5ad   :  { %2978 = vmatpush3.bf16.msra.mxu0 %v3526_v43 }
 0x5ae   :  { %2980 = vmatprep.subr.bf16.mxu0 %v3538_v46 }
 0x5b1   :  { %2982 = vmatpush3.bf16.msra.mxu0 %v3538_v46 }
 0x5b2   :  { %2984 = vmatprep.subr.bf16.mxu0 %v3548_v49 }
 0x5b5   :  { %2986 = vmatpush3.bf16.msra.mxu0 %v3548_v49 }
 0x5b6   :  { %2988 = vmatprep.subr.bf16.mxu0 %v3568_v55 }
 0x5b9   :  { %2990 = vmatpush3.bf16.msra.mxu0 %v3568_v55 }
 0x5ba   :  { %3024 = vmatprep.subr.bf16.mxu0 %v3671_v41 }
 0x66f   :  { %v3999_v15 = vpop.f32.mrb[16].mxu0 }
 0x670   :  { %v4001_v25 = vpop.f32.mrb[17].mxu0 }
 0x671   :  { %2620 = vmatprep.mubr.f32.mxu0 %v4001_v25 }
 0x672   :  { %2621 = vmatmul.mubr.f32.vlgmr.msra.gmra.mrb[24].mxu0 %v3999_v15 }
 0x673   :  { %v4005_v31 = vpop.f32.mrb[18].mxu0  ;;  %3026 = vmatpush3.bf16.msra.mxu0 %v3671_v41 }
 0x674   :  { %v1470_v32 = vadd.f32 %v4005_v31, %v3999_v15  ;;  %v4010_v33 = vpop.f32.mrb[19].mxu0  ;;  %3028 = vmatprep.subr.bf16.mxu0 %v3681_v47 }
 0x675   :  { %v1469_v37 = vadd.f32 %v4010_v33, %v4001_v25  ;;  %2623 = vmatprep.mubr.f32.mxu0 %v4010_v33 }
 0x676   :  { %2624 = vmatmul.mubr.f32.gmra.mrb[26].mxu0 %v4005_v31 }
 0x677   :  { %v4017_v38 = vpop.f32.mrb[20].mxu0  ;;  %3030 = vmatpush3.bf16.msra.mxu0 %v3681_v47 }
 0x678   :  { %v1472_v39 = vadd.f32 %v4017_v38, %v1470_v32  ;;  %v4021_v42 = vpop.f32.mrb[21].mxu0  ;;  %3032 = vmatprep.subr.bf16.mxu0 %v3691_v51 }
 0x679   :  { %v1471_v43 = vadd.f32 %v1469_v37, %v4021_v42  ;;  %2626 = vmatprep.mubr.f32.mxu0 %v4021_v42 }
 0x67a   :  { %2627 = vmatmul.mubr.f32.gmra.mrb[28].mxu0 %v4017_v38 }
 0x67b   :  { %v4027_v46 = vpop.f32.mrb[22].mxu0  ;;  %3034 = vmatpush3.bf16.msra.mxu0 %v3691_v51  ;;  %v4227_v51 = vld [vmem:[#allocation11_spill] sm:$0xff] }
 0x67c   :  { %v4031_v49 = vadd.f32 %v4027_v46, %v1472_v39  ;;  %v4033_v55 = vpop.f32.mrb[23].mxu0  ;;  %3036 = vmatprep.subr.bf16.mxu0 %v3701_v56 }
 0x67d   :  { %v4037_v41 = vadd.f32 %v1471_v43, %v4033_v55  ;;  %2629 = vmatprep.mubr.f32.mxu0 %v4033_v55 }
 0x67e   :  { %2630 = vmatmul.mubr.f32.gmra.mrb[30].mxu0 %v4027_v46 }
 0x67f   :  { %2664 = vmatprep.mubr.f32.mxu1 %v4037_v41  ;;  %3038 = vmatpush3.bf16.msra.mxu0 %v3701_v56 }
 0x680   :  { %2665 = vmatmul.mubr.f32.vlgmr.msra.gmra.mrb[30].mxu1 %v4031_v49  ;;  %3040 = vmatprep.subr.bf16.mxu0 %v3711_v60 }
 0x683   :  { %3042 = vmatpush3.bf16.msra.mxu0 %v3711_v60 }
 0x684   :  { %3044 = vmatprep.subr.bf16.mxu0 %v4222_v44 }
 0x687   :  { %3046 = vmatpush3.bf16.msra.mxu0 %v4222_v44 }
 0x688   :  { %3048 = vmatprep.subr.bf16.mxu0 %v4223_v26 }
 0x68b   :  { %3050 = vmatpush3.bf16.msra.mxu0 %v4223_v26 }
 0x68c   :  { %3052 = vmatprep.subr.bf16.mxu0 %v4224_v50 }
 0x68f   :  { %3054 = vmatpush3.bf16.msra.mxu0 %v4224_v50 }
 0x745   :  { %v2622_v47 = vpop.f32.mrb[24].mxu0 }
 0x746   :  { %v1565_v56 = vadd.f32 %v2622_v47, %v4227_v51  ;;  %v1430_v23 = vpop.f32.mrb[25].mxu0 }
 0x747   :  { %v1564_v9 = vadd.f32 %v1430_v23, %v4228_v11 }
 0x748   :  { %v2061_v21 = vmul.f32 -1.442695, %v1565_v56 }
 0x749   :  { %v2060_v60 = vmul.f32 -1.442695, %v1564_v9  ;;  %v2625_v17 = vpop.f32.mrb[26].mxu0 }
 0x74a   :  { %3183 = vpow2.f32 %v2061_v21  ;;  %v1583_v44 = vadd.f32 %v2625_v17, %v4227_v51  ;;  %v1440_v20 = vpop.f32.mrb[27].mxu0 }
 0x74b   :  { %3185 = vpow2.f32 %v2060_v60  ;;  %v1582_v26 = vadd.f32 %v1440_v20, %v4228_v11 }
 0x74c   :  { %v2063_v29 = vmul.f32 -1.442695, %v1583_v44 }
 0x74d   :  { %v2062_v30 = vmul.f32 -1.442695, %v1582_v26  ;;  %v2628_v22 = vpop.f32.mrb[28].mxu0 }
 0x74e   :  { %3187 = vpow2.f32 %v2063_v29  ;;  %v1601_v50 = vadd.f32 %v2628_v22, %v4227_v51  ;;  %v1450_v27 = vpop.f32.mrb[29].mxu0 }
 0x74f   :  { %3189 = vpow2.f32 %v2062_v30  ;;  %v1600_v34 = vadd.f32 %v1450_v27, %v4228_v11 }
 0x750   :  { %v2065_v52 = vmul.f32 -1.442695, %v1601_v50 }
 0x751   :  { %v2064_v58 = vmul.f32 -1.442695, %v1600_v34  ;;  %v2631_v61 = vpop.f32.mrb[30].mxu0 }
 0x752   :  { %3191 = vpow2.f32 %v2065_v52  ;;  %v1619_v19 = vadd.f32 %v2631_v61, %v4227_v51  ;;  %v1460_v57 = vpop.f32.mrb[31].mxu0 }
 0x753   :  { %3193 = vpow2.f32 %v2064_v58  ;;  %v1618_v0 = vadd.f32 %v1460_v57, %v4228_v11  ;;  %v4060_v36 = vpop.f32.mrb[30].mxu1 }
 0x754   :  { %v3184_v3 = vpop.eup %3183  ;;  %v2067_v16 = vmul.f32 -1.442695, %v1619_v19  ;;  %v1541_v53 = vpop.f32.mrb[31].mxu1  ;;  %v1551_v50 = vadd.f32 %v4060_v36, %v3805_v24 }
 0x755   :  { %v3186_v8 = vpop.eup %3185  ;;  %v1573_v7 = vadd.f32 1.0, %v3184_v3  ;;  %v2066_v12 = vmul.f32 -1.442695, %v1618_v0  ;;  %v1550_v27 = vadd.f32 %v1541_v53, %v3808_v28 }
 0x756   :  { %v1572_v4 = vadd.f32 1.0, %v3186_v8  ;;  %3195 = vpow2.f32 %v2067_v16  ;;  %v2059_v34 = vmul.f32 -1.442695, %v1551_v50 }
 0x757   :  { %3197 = vrcp.f32 %v1573_v7  ;;  %v2058_v52 = vmul.f32 -1.442695, %v1550_v27 }
 0x758   :  { %v3188_v1 = vpop.eup %3187  ;;  %3199 = vrcp.f32 %v1572_v4 }
 0x759   :  { %v3190_v35 = vpop.eup %3189  ;;  %v1591_v63 = vadd.f32 1.0, %v3188_v1  ;;  %3201 = vpow2.f32 %v2066_v12 }
 0x75a   :  { %v1590_v13 = vadd.f32 1.0, %v3190_v35 }
 0x75b   :  { %3203 = vrcp.f32 %v1591_v63 }
 0x75c   :  { %v3192_v2 = vpop.eup %3191  ;;  %3205 = vrcp.f32 %v1590_v13 }
 0x75d   :  { %v3194_v59 = vpop.eup %3193  ;;  %v1609_v48 = vadd.f32 1.0, %v3192_v2 }
 0x75e   :  { %v1608_v5 = vadd.f32 1.0, %v3194_v59  ;;  %v1804_v59 = vld [vmem:[%s4197_s10] sm:$0xff] }
 0x75f   :  { %3207 = vrcp.f32 %v1609_v48  ;;  %v1805_v48 = vld [vmem:[%s4197_s10 + $0x8] sm:$0xff] }
 0x760   :  { %v3196_v6 = vpop.eup %3195  ;;  %3209 = vrcp.f32 %v1608_v5 }
 0x761   :  { %v3198_v40 = vpop.eup %3197  ;;  %v1627_v18 = vadd.f32 1.0, %v3196_v6 }
 0x762   :  { %v3200_v62 = vpop.eup %3199  ;;  %v1579_v32 = vmul.f32 %v3198_v40, %v3999_v15  ;;  %v1808_v40 = vld [vmem:[%s4197_s10 + $0x20] sm:$0xff] }
 0x763   :  { %v3202_v37 = vpop.eup %3201  ;;  %3211 = vrcp.f32 %v1627_v18  ;;  %v1578_v39 = vmul.f32 %v3200_v62, %v4001_v25  ;;  %v1809_v18 = vld [vmem:[%s4197_s10 + $0x28] sm:$0xff] }
 0x764   :  { %v1626_v43 = vadd.f32 1.0, %v3202_v37  ;;  %v3065_v62 = vpack.c.bf16 %v1809_v18, %v1808_v40  ;;  %v1811_v37 = vld [vmem:[%s4197_s10 + $0x38] sm:$0xff] }
 0x765   :  { %v3204_v47 = vpop.eup %3203 }
 0x766   :  { %v3206_v51 = vpop.eup %3205  ;;  %v1597_v56 = vmul.f32 %v3204_v47, %v4005_v31  ;;  %3213 = vrcp.f32 %v1626_v43  ;;  %v1812_v43 = vld [vmem:[%s4197_s10 + $0x40] sm:$0xff]  ;;  %v1813_v47 = vld [vmem:[%s4197_s10 + $0x48] sm:$0xff] }
 0x767   :  { %v1596_v23 = vmul.f32 %v3206_v51, %v4010_v33  ;;  %v3279_v33 = vmov 0.0|0.0   ;;  %3215 = vpow2.f32 %v2059_v34  ;;  %v3071_v51 = vpack.c.bf16 %v1813_v47, %v1812_v43 }
 0x768   :  { %v1599_v11 = vadd.f32 %v1597_v56, %v1579_v32  ;;  %3055 = vmatprep.subr.bf16.mxu1 %v3279_v33  ;;  %3082 = vmatprep.subr.bf16.mxu0 %v3279_v33  ;;  %3217 = vpow2.f32 %v2058_v52  ;;  %v1810_v32 = vld [vmem:[%s4197_s10 + $0x30] sm:$0xff] }
 0x769   :  { %v3208_v9 = vpop.eup %3207  ;;  %v1598_v21 = vadd.f32 %v1596_v23, %v1578_v39  ;;  %v3068_v39 = vpack.c.bf16 %v1811_v37, %v1810_v32  ;;  %v1814_v56 = vld [vmem:[%s4197_s10 + $0x50] sm:$0xff]  ;;  %v1815_v23 = vld [vmem:[%s4197_s10 + $0x58] sm:$0xff] }
 0x76a   :  { %v3210_v60 = vpop.eup %3209  ;;  %v1615_v17 = vmul.f32 %v3208_v9, %v4017_v38  ;;  %v4229_v38 = vmov 0.0   ;;  %v1816_v9 = vld [vmem:[%s4197_s10 + $0x60] sm:$0xff] }
 0x76b   :  { %v1614_v15 = vmul.f32 %v3210_v60, %v4021_v42  ;;  %2706 = vmatprep.mubr.msk.f32.mxu1 %vm3280_vm1, %v4229_v38  ;;  %v1802_v42 = vld [vmem:[%s4196_s9] sm:$0xff] }
 0x76c   :  { %v1617_v44 = vadd.f32 %v1615_v17, %v1599_v11  ;;  %v3074_v11 = vpack.c.bf16 %v1815_v23, %v1814_v56  ;;  %v1818_v17 = vld [vmem:[%s4197_s10 + $0x70] sm:$0xff] }
 0x76d   :  { %v3212_v20 = vpop.eup %3211  ;;  %v1616_v26 = vadd.f32 %v1614_v15, %v1598_v21  ;;  %v1817_v21 = vld [vmem:[%s4197_s10 + $0x68] sm:$0xff]  ;;  %v1819_v15 = vld [vmem:[%s4197_s10 + $0x78] sm:$0xff] }
 0x76e   :  { %v1633_v25 = vmul.f32 %v3212_v20, %v4027_v46  ;;  %v1803_v46 = vld [vmem:[%s4196_s9 + $0x8] sm:$0xff]  ;;  %v3077_v60 = vpack.c.bf16 %v1817_v21, %v1816_v9  ;;  %v1801_v20 = vld [vmem:[%s4187_s0] sm:$0xff] }
 0x770   :  { %v3214_v29 = vpop.eup %3213  ;;  %v1635_v30 = vadd.f32 %v1633_v25, %v1617_v44  ;;  %v3080_v44 = vpack.c.bf16 %v1819_v15, %v1818_v17 }
 0x771   :  { %v1632_v31 = vmul.f32 %v3214_v29, %v4033_v55  ;;  %v3083_v55 = vpack.c.bf16 %v1803_v46, %v1802_v42  ;;  %v3216_v58 = vpop.eup %3215 }
 0x772   :  { %v3218_v61 = vpop.eup %3217  ;;  %v1559_v19 = vadd.f32 1.0, %v3216_v58 }
 0x773   :  { %v1634_v22 = vadd.f32 %v1632_v31, %v1616_v26  ;;  %v1558_v57 = vadd.f32 1.0, %v3218_v61  ;;  %v1972_v26 = vld [vmem:[%s4200_s13] sm:$0xff] }
 0x774   :  { %3219 = vrcp.f32 %v1559_v19  ;;  %1975 = vperm.xlu1 %3094, %v1972_v26  }
 0x775   :  { %2699 = vmatprep.mubr.f32.mxu0 %v1634_v22  ;;  %3221 = vrcp.f32 %v1558_v57 }
 0x776   :  { %2700 = vmatmul.mubr.f32.vlgmr.msra.gmra.mrb[32].mxu0 %v1635_v30 }
 0x777   :  { %2748 = vmatprep.mubr.msk.f32.mxu0 %vm3280_vm1, %v4229_v38  ;;  %3084 = vmatpush3.bf16.msra.mxu0 %v3083_v55 }
 0x77a   :  { %2749 = vmatmul.mubr.msk.f32.vlgmr.msra.gmra.mrb[34].mxu0 %vm134_vm0, %v1801_v20 }
 0x77e   :  { %v3220_v24 = vpop.eup %3219 }
 0x77f   :  { %v3222_v28 = vpop.eup %3221  ;;  %v1716_v36 = vsub.f32 1.0, %v3220_v24 }
 0x780   :  { %v1715_v53 = vsub.f32 1.0, %v3222_v28 }
 0x781   :  { %v1718_v1 = vmul.f32 %v1716_v36, %v4031_v49  ;;  %v1727_v49 = vld [vmem:[%s4190_s3] sm:$0xff] }
 0x782   :  { %v1717_v63 = vmul.f32 %v1715_v53, %v4037_v41  ;;  %v3059_v41 = vpack.c.bf16 %v1805_v48, %v1804_v59 }
 0x849   :  { %v2701_v0 = vpop.f32.mrb[32].mxu0 }
 0x84a   :  { %v1712_v3 = vadd.f32 %v2701_v0, %v3817_v10  ;;  %v1702_v16 = vpop.f32.mrb[33].mxu0 }
 0x84b   :  { %v1711_v8 = vadd.f32 %v1702_v16, %v3820_v45 }
 0x84c   :  { %3223 = vtanh.f32 %v1712_v3 }
 0x84d   :  { %3225 = vtanh.f32 %v1711_v8  ;;  %v1959_v30 = vpop.f32.mrb[34].mxu0 }
 0x84e   :  { %v2750_v31 = vpop.f32.mrb[35].mxu0 }
 0x856   :  { %v3224_v7 = vpop.eup %3223 }
 0x857   :  { %v3226_v12 = vpop.eup %3225  ;;  %v1720_v4 = vmul.f32 %v3224_v7, %v3220_v24 }
 0x858   :  { %v1719_v35 = vmul.f32 %v3226_v12, %v3222_v28 }
 0x859   :  { %v1722_v13 = vadd.f32 %v1720_v4, %v1718_v1 }
 0x85a   :  { %v1721_v2 = vadd.f32 %v1719_v35, %v1717_v63 }
 0x85b   :  { %v1724_v10 = vmul.f32 %v1722_v13, %v3828_v14  ;;  %v1807_v14 = vld [vmem:[%s4197_s10 + $0x18] sm:$0xff] }
 0x85c   :  { %v1723_v45 = vmul.f32 %v1721_v2, %v3824_v54  ;;  %v1806_v54 = vld [vmem:[%s4197_s10 + $0x10] sm:$0xff]  ;;  %s3281_s10 = smov [#allocation4]  }
 0x85d   :  { %1726 = vst [vmem:[#allocation4 + $0x8] sm:$0xff] %v1724_v10  ;;  %v3062_v6 = vpack.c.bf16 %v1807_v14, %v1806_v54  ;;  %s1995_s8 = sshll.u32 %s3281_s10, 4  ;;  %s1996_s8 = int_to_ptr.vmem [resolvable:$true] %s1995_s8 }
 0x85e   :  { %v3056_v5 = vpack.c.bf16 %v1724_v10, %v1723_v45  ;;  %1725 = vst [vmem:[#allocation4] sm:$0xff] %v1723_v45  ;;  %s3229_s25 = scalar_lea.vmem %s1996_s8, 256  ;;  %p3234_p1 = scmp.lt.s32.totalorder %s1996_s8, %s1996_s8 }
 0x85f   :  { %p3230_p0 = scmp.ne.s32.totalorder %s1996_s8, %s3229_s25  ;;  %p3235_p2 = scmp.lt.s32.totalorder %s3229_s25, %s3229_s25 }
 0x860   :  { %3057 = vmatpush3.bf16.msra.mxu1 %v3056_v5 }
 0x861   :  { %3058 = vmatprep.subr.bf16.mxu1 %v3279_v33  ;;  %p3236_p3 = por %p3235_p2, %p3234_p1 }
 0x863   :  { %2707 = vmatmul.mubr.msk.f32.vlgmr.msra.gmra.mrb[32].mxu1 %vm134_vm0, %v1727_v49  ;;  %p3237_p4 = pnand %p3236_p3, %p3230_p0 }
 0x864   :  { %3060 = vmatpush3.bf16.msra.mxu1 %v3059_v41  ;;  %2741 = vmatprep.mubr.msk.f32.mxu1 %vm3280_vm1, %v4229_v38 }
 0x865   :  { %3061 = vmatprep.subr.bf16.mxu1 %v3279_v33 }
 0x868   :  { %3063 = vmatpush3.bf16.msra.mxu1 %v3062_v6 }
 0x869   :  { %3064 = vmatprep.subr.bf16.mxu1 %v3279_v33 }
 0x86c   :  { %3066 = vmatpush3.bf16.msra.mxu1 %v3065_v62 }
 0x86d   :  { %3067 = vmatprep.subr.bf16.mxu1 %v3279_v33 }
 0x870   :  { %3069 = vmatpush3.bf16.msra.mxu1 %v3068_v39 }
 0x871   :  { %3070 = vmatprep.subr.bf16.mxu1 %v3279_v33 }
 0x874   :  { %3072 = vmatpush3.bf16.msra.mxu1 %v3071_v51 }
 0x875   :  { %3073 = vmatprep.subr.bf16.mxu1 %v3279_v33 }
 0x878   :  { %3075 = vmatpush3.bf16.msra.mxu1 %v3074_v11 }
 0x879   :  { %3076 = vmatprep.subr.bf16.mxu1 %v3279_v33 }
 0x87c   :  { %3078 = vmatpush3.bf16.msra.mxu1 %v3077_v60 }
 0x87d   :  { %3079 = vmatprep.subr.bf16.mxu1 %v3279_v33 }
 0x880   :  { %3081 = vmatpush3.bf16.msra.mxu1 %v3080_v44 }
 0x936   :  { %v1797_v25 = vpop.f32.mrb[32].mxu1 }
 0x937   :  { %v2708_v29 = vpop.f32.mrb[33].mxu1  ;;  %2742 = vmatmul.mubr.f32.vlgmr.msra.gmra.mrb[34].mxu1 %v1797_v25 }
 0x938   :  { %3240 = shalt.err (!%p3237_p4)
}
 0x939   :  { %s3241_s26 = scalar_lea.hbm %s4202_s15, 256 }
 0x93a   :  { %p3242_p5 = scmp.ne.s32.totalorder %s4202_s15, %s3241_s26  ;;  %p3245_p6 = scmp.lt.u32.totalorder %s3241_s26, %s4202_s15 }
 0x93c   :  { %p3247_p7 = pnand %p3245_p6, %p3242_p5 }
 0x93e   :  { %3250 = shalt.err (!%p3247_p7)
}
 0x93f   :  { %s3282_s6 = smov 128   ;;  %s3283_s2 = smov 8   ;;  %v2070_v33 = vld [vmem:[%s4198_s11] ss:$0 sm:$0xff]  ;;  %v1976_v55 = vpop.permute.xlu1 %1975 }
 0x940   :  { %2001 = dma.vmem_to_hbm [thread:$0]  %s1996_s8, 256, %s4202_s15, [#allocation5], %s3282_s6, %s3282_s6, %s3283_s2  }
 0x941   :  { %s3284_s16 = smov [#allocation2]  }
 0x942   :  { %s1986_s17 = sshll.u32 %s3284_s16, 4  ;;  %s1987_s17 = int_to_ptr.vmem [resolvable:$true] %s1986_s17 }
 0x943   :  { %s3251_s18 = scalar_lea.vmem %s1987_s17, 128  ;;  %p3256_p9 = scmp.lt.s32.totalorder %s1987_s17, %s1987_s17 }
 0x944   :  { %p3252_p8 = scmp.ne.s32.totalorder %s1987_s17, %s3251_s18  ;;  %p3257_p10 = scmp.lt.s32.totalorder %s3251_s18, %s3251_s18 }
 0x946   :  { %p3258_p11 = por %p3257_p10, %p3256_p9 }
 0x948   :  { %p3259_p12 = pnand %p3258_p11, %p3252_p8 }
 0xa0a   :  { %v1886_v22 = vpop.f32.mrb[34].mxu1 }
 0xa0b   :  { %v1960_v38 = vadd.f32 %v1959_v30, %v1886_v22  ;;  %v2743_v42 = vpop.f32.mrb[35].mxu1 }
 0xa0d   :  { %v1970_v46 = vadd.f32 %v2070_v33, %v1960_v38 }
 0xa0f   :  { %v1971_v50 = vmax.f32 %v1970_v46, 0.0 }
 0xa11   :  { %v1978_v27 = vmul.f32 %v1976_v55, %v1971_v50 }
 0xa13   :  { %1979 = vst [vmem:[#allocation2] sm:$0xff] %v1978_v27 }
 0xa14   :  { %3262 = shalt.err (!%p3259_p12)
}
 0xa15   :  { %s3263_s11 = scalar_lea.hbm %s4201_s14, 128 }
 0xa16   :  { %p3264_p13 = scmp.ne.s32.totalorder %s4201_s14, %s3263_s11  ;;  %p3267_p0 = scmp.lt.u32.totalorder %s3263_s11, %s4201_s14 }
 0xa18   :  { %p3269_p1 = pnand %p3267_p0, %p3264_p13 }
 0xa1a   :  { %3272 = shalt.err (!%p3269_p1)
}
 0xa1b   :  { %1989 = dma.vmem_to_hbm [thread:$0]  %s1987_s17, 128, %s4201_s14, [#allocation3]  }
 0xa1c   :  { %3273 = dma.done.wait [#allocation3], 128  }
 0xa1d   :  { %3274 = vsyncadd [#allocation3], 4294967168 }
 0xa1e   :  { %3275 = dma.done.wait [#allocation5], 256  }
 0xa1f   :  { %3276 = vsyncadd [#allocation5], 4294967040 }
 0xa20   :  { %2008 = vsyncpa [#allocation3], 1 }
 0xa21   :  { %2009 = vsyncpa [#allocation5], 1 }

</bundles_post_ra>
